<compile_context>
chip_gen: v7x
topology: tpu7x:2x2x1
jax: 0.10.0
libtpu: 0.0.40
codegen_flags: <defaults>
</compile_context>

<pallas_src>
import functools

import numpy as np
import jax
import jax.numpy as jnp
from jax.experimental import pallas as pl
from jax.experimental.pallas import tpu as pltpu


# ---------------------------------------------------------------------------
# Fused per-batch kernel
#   refs per grid step n:
#     xt_ref   : (1, Tin,  V*P)   input, layout [c, v*P+p]        (lane-dense)
#     xvt_ref  : (1, Tin*P, V)    input, layout [c*P+p, v]
#     wmt_ref  : (Tout, Tin)      mapping weight, transposed
#     b_ref    : (Tout, 1)        mapping bias
#     ksrc_ref : (Tout, Tin*P)    folded src coefficients  (W_map . C_src)
#     kdst_ref : (Tout, Tin*P)    folded dst coefficients  (W_map . C_dst)
#     beta_ref : (Tout, 2)        folded bias terms [src, dst]
#     adj_ref  : (V, V)           normalized adjacency
#     o_ref    : (1, Tout, V*P)   output, layout [t, k*P+p]       (lane-dense)
# ---------------------------------------------------------------------------
def _fused_kernel(alpha, xt_ref, xvt_ref, wmt_ref, b_ref, ksrc_ref, kdst_ref,
                  beta_ref, adj_ref, o_ref):
    Tout, _Tin = wmt_ref.shape
    V = adj_ref.shape[0]
    VP = xt_ref.shape[2]
    P = VP // V
    hi = jax.lax.Precision.HIGHEST  # tiny contraction dims; cost negligible here

    # (1) temporal mapping (1x1 conv == matmul) on the MXU, lane-dense result.
    #     wh_t[t, v*P + p] = Wh[v, p, t]
    wh_t = jnp.dot(wmt_ref[...], xt_ref[0],
                   preferred_element_type=jnp.float32, precision=hi) + b_ref[...]

    # (2) attention logits via the src/dst decomposition (a_input never built).
    #     s_srcT[t', i] , s_dstT[t', j]
    xvt = xvt_ref[0]                                                 # (Tin*P, V)
    s_srcT = jnp.dot(ksrc_ref[...], xvt, preferred_element_type=jnp.float32,
                     precision=hi) + beta_ref[:, 0:1]                # (Tout, V)
    s_dstT = jnp.dot(kdst_ref[...], xvt, preferred_element_type=jnp.float32,
                     precision=hi) + beta_ref[:, 1:2]                # (Tout, V)

    # e[t, j*V + i] = s_src[i, t] + s_dst[j, t]   (time on sublanes, pairs on lanes)
    e = jnp.concatenate([s_srcT + s_dstT[:, j:j + 1] for j in range(V)], axis=1)
    e = jnp.where(e >= 0.0, e, alpha * e)                            # LeakyReLU

    # (3) softmax over the temporal axis (sublane reduction).
    m = jnp.max(e, axis=0, keepdims=True)
    p_un = jnp.exp(e - m)
    denom = jnp.sum(p_un, axis=0, keepdims=True)
    # exact reciprocal to stay within 1e-4 of the f32 reference; approx=True routes
    # to the EUP vrcp if looser tolerance is acceptable.
    att = p_un * pl.reciprocal(denom, approx=False)                  # (Tout, V*V)

    # (4) fold the normalized adjacency into the attention first (tiny matmuls),
    #     then aggregate with lane-dense broadcast-FMAs.
    adj = adj_ref[...]                                               # (V_i, V_k)
    # wjs[j][t, k] = sum_i att[i, j, t] * adj[i, k]
    wjs = [jnp.dot(att[:, j * V:(j + 1) * V], adj,
                   preferred_element_type=jnp.float32, precision=hi)
           for j in range(V)]

    cols = []
    for k in range(V):
        acc = jnp.zeros((Tout, P), jnp.float32)
        for j in range(V):
            acc = acc + wjs[j][:, k:k + 1] * wh_t[:, j * P:(j + 1) * P]
        cols.append(acc)
    out = jnp.concatenate(cols, axis=-1)                             # (Tout, V*P)

    # (5) ELU (alpha=1), single lane-dense store.
    o_ref[0] = jnp.where(out > 0.0, out, jnp.exp(out) - 1.0)


# ---------------------------------------------------------------------------
# Full forward: tiny host-side precompute + one fused pallas_call
# ---------------------------------------------------------------------------
def gat_layer_temporal(h, params, alpha=0.2):
    # h: (N, H, W, Tin, V)
    N, H, W, Tin, V = h.shape
    Wm, bm, a_param, B_param = (params["W_map"], params["b_map"],
                                params["a"], params["B"])
    Tout = Wm.shape[1]
    P = H * W
    hi = jax.lax.Precision.HIGHEST

    # --- coefficient tensors reproducing the exact torch `.view` pattern ---------
    # all_comb (H, 2W, Tout) flattened row-major is reinterpreted as (Tout, 2HW):
    # linear index L = h*2W*T + w2*T + t  ->  t' = L // 2HW,  m = L % 2HW.
    a_vec = a_param.reshape(-1)
    twoHW = 2 * H * W
    hh = jnp.arange(H)[:, None, None]
    ww = jnp.arange(W)[None, :, None]
    tt = jnp.arange(Tout)[None, None, :]
    L_src = hh * (2 * W * Tout) + ww * Tout + tt          # w2 = w      (chunks half)
    L_dst = L_src + W * Tout                              # w2 = w + W  (alternating)

    def coeff(L):
        sel = (L // twoHW)[None, ...] == jnp.arange(Tout)[:, None, None, None]
        vals = a_vec[L % twoHW][None, ...]
        return (vals * sel).reshape(Tout, P, Tout)        # C[t', p, t]

    C_src = coeff(L_src)
    C_dst = coeff(L_dst)

    # fold the temporal mapping into the coefficients:
    #   s_src[i, t'] = sum_{c,p} x[i, p, c] * K_src[t', c, p] + beta_src[t']
    ksrcT = jnp.einsum('ct,spt->scp', Wm, C_src, precision=hi).reshape(Tout, Tin * P)
    kdstT = jnp.einsum('ct,spt->scp', Wm, C_dst, precision=hi).reshape(Tout, Tin * P)
    betas = jnp.stack([jnp.einsum('t,spt->s', bm, C_src, precision=hi),
                       jnp.einsum('t,spt->s', bm, C_dst, precision=hi)], axis=1)

    # --- normalized adjacency (tiny V x V; same math as torch D^-1/2 A D^-1/2) ---
    adj = B_param + jnp.eye(V, dtype=B_param.dtype)
    adj = (adj - jnp.min(adj)) / (jnp.max(adj) - jnp.min(adj))
    d12 = 1.0 / jnp.sqrt(jnp.sum(adj, axis=1))
    adj_norm = adj * d12[:, None] * d12[None, :]

    # --- lane-dense input layouts for the fused kernel ---------------------------
    x_t = jnp.transpose(h, (0, 3, 4, 1, 2)).reshape(N, Tin, V * P)   # [n, c, v*P+p]
    xvt = jnp.transpose(h, (0, 3, 1, 2, 4)).reshape(N, Tin * P, V)   # [n, c*P+p, v]
    wmt = Wm.T
    b2 = bm.reshape(Tout, 1)

    # one fused kernel per batch element (everything stays resident in VMEM).
    # For much larger shapes add a spatial tile axis to the grid (keeps v7x's two
    # TensorCores fed and the per-step VMEM block bounded).
    out_flat = pl.pallas_call(
        functools.partial(_fused_kernel, alpha),
        out_shape=jax.ShapeDtypeStruct((N, Tout, V * P), jnp.float32),
        grid=(N,),
        in_specs=[
            pl.BlockSpec((1, Tin, V * P), lambda n: (n, 0, 0)),
            pl.BlockSpec((1, Tin * P, V), lambda n: (n, 0, 0)),
            pl.BlockSpec((Tout, Tin), lambda n: (0, 0)),
            pl.BlockSpec((Tout, 1), lambda n: (0, 0)),
            pl.BlockSpec((Tout, Tin * P), lambda n: (0, 0)),
            pl.BlockSpec((Tout, Tin * P), lambda n: (0, 0)),
            pl.BlockSpec((Tout, 2), lambda n: (0, 0)),
            pl.BlockSpec((V, V), lambda n: (0, 0)),
        ],
        out_specs=pl.BlockSpec((1, Tout, V * P), lambda n: (n, 0, 0)),
        compiler_params=pltpu.CompilerParams(dimension_semantics=("parallel",)),
    )(x_t, xvt, wmt, b2, ksrcT, kdstT, betas, adj_norm)

    # (N, Tout, V, H, W) -> (N, H, W, Tout, V)
    return jnp.transpose(out_flat.reshape(N, Tout, V, H, W), (0, 3, 4, 1, 2))


# ---------------------------------------------------------------------------
# Pure-JAX reference, faithful to the PyTorch module (materializes a_input)
# ---------------------------------------------------------------------------
def gat_layer_temporal_ref(h, params, alpha=0.2):
    N, H, W, Tin, V = h.shape
    h_p = jnp.transpose(h, (0, 4, 1, 2, 3))
    Wm, bm, a_param, B_param = (params["W_map"], params["b_map"],
                                params["a"], params["B"])
    Tout = Wm.shape[1]
    hi = jax.lax.Precision.HIGHEST

    Wh = jnp.einsum("nvhwc,cd->nvhwd", h_p, Wm, precision=hi) + bm
    chunks = jnp.repeat(Wh, V, axis=1)
    alternating = jnp.tile(Wh, (1, V, 1, 1, 1))
    all_comb = jnp.concatenate([chunks, alternating], axis=-2)
    a_input = all_comb.reshape(N, V, V, Tout, 2 * H * W)
    e = jnp.einsum("nijtm,m->nijt", a_input, a_param.reshape(-1), precision=hi)
    e = jnp.where(e >= 0, e, alpha * e)
    att = jax.nn.softmax(e, axis=-1)

    adj = B_param + jnp.eye(V, dtype=B_param.dtype)
    adj = (adj - jnp.min(adj)) / (jnp.max(adj) - jnp.min(adj))
    D12 = jnp.diag(1.0 / jnp.sqrt(jnp.sum(adj, axis=1)))
    adj_norm = D12 @ adj @ D12

    Wh_v = Wh.reshape(N, V, H * W, Tout)
    M = jnp.einsum("nijt,njpt->nipt", att, Wh_v, precision=hi)
    out = jnp.einsum("nipt,ik->nptk", M, adj_norm, precision=hi)
    out = jnp.where(out > 0, out, jnp.exp(out) - 1.0)
    return out.reshape(N, H, W, Tout, V)


if __name__ == "__main__":
    # small shapes: batch=2, vertices=4, spatial 8x8, in_features=6, out_features=8
    N, V, H, W = 2, 4, 8, 8
    Tin, Tout = 6, 8
    alpha = 0.2

    key = jax.random.PRNGKey(0)
    k1, k2, k3, k4, k5 = jax.random.split(key, 5)

    # deterministic parameter init (shapes per module __init__)
    W_map = jax.random.normal(k1, (Tin, Tout), jnp.float32) * (1.0 / np.sqrt(Tin))
    b_map = jax.random.normal(k2, (Tout,), jnp.float32) * 0.01
    limit = 1.414 * np.sqrt(6.0 / (2 * H * W + 1))               # xavier_uniform gain=1.414
    a_param = jax.random.uniform(k3, (2 * H * W, 1), jnp.float32, -limit, limit)
    B_param = jax.random.uniform(k4, (V, V), jnp.float32, 0.0, 0.1) + 1e-6

    params = {"W_map": W_map, "b_map": b_map, "a": a_param, "B": B_param}

    h = jax.random.normal(k5, (N, H, W, Tin, V), jnp.float32)

    out = gat_layer_temporal(h, params, alpha)
    out = jax.block_until_ready(out)

    ref = jax.block_until_ready(gat_layer_temporal_ref(h, params, alpha))
    np.testing.assert_allclose(np.asarray(out), np.asarray(ref), rtol=2e-4, atol=2e-4)

    print("KERNEL_OK")
</pallas_src>

<mosaic_0001>
module attributes {stable_mosaic.version = 11 : i64} {
  func.func @_fused_kernel(%arg0: i32, %arg1: memref<1x6x256xf32, #tpu.memory_space<vmem>>, %arg2: memref<1x384x4xf32, #tpu.memory_space<vmem>>, %arg3: memref<8x6xf32, #tpu.memory_space<vmem>>, %arg4: memref<8x1xf32, #tpu.memory_space<vmem>>, %arg5: memref<8x384xf32, #tpu.memory_space<vmem>>, %arg6: memref<8x384xf32, #tpu.memory_space<vmem>>, %arg7: memref<8x2xf32, #tpu.memory_space<vmem>>, %arg8: memref<4x4xf32, #tpu.memory_space<vmem>>, %arg9: memref<1x8x256xf32, #tpu.memory_space<vmem>>) attributes {dimension_semantics = [#tpu.dimension_semantics<parallel>], iteration_bounds = array<i64: 2>, scalar_prefetch = 0 : i64, scratch_operands = 0 : i64, tpu.core_type = #tpu.core_type<tc>, window_params = [{transform_indices = @transform_0, window_bounds = array<i64: 1, 6, 256>}, {transform_indices = @transform_1, window_bounds = array<i64: 1, 384, 4>}, {pipeline_mode = #tpu.pipeline_mode<synchronous>, transform_indices = @transform_2, window_bounds = array<i64: 8, 6>}, {pipeline_mode = #tpu.pipeline_mode<synchronous>, transform_indices = @transform_3, window_bounds = array<i64: 8, 1>}, {pipeline_mode = #tpu.pipeline_mode<synchronous>, transform_indices = @transform_4, window_bounds = array<i64: 8, 384>}, {pipeline_mode = #tpu.pipeline_mode<synchronous>, transform_indices = @transform_5, window_bounds = array<i64: 8, 384>}, {pipeline_mode = #tpu.pipeline_mode<synchronous>, transform_indices = @transform_6, window_bounds = array<i64: 8, 2>}, {pipeline_mode = #tpu.pipeline_mode<synchronous>, transform_indices = @transform_7, window_bounds = array<i64: 4, 4>}, {transform_indices = @transform_8, window_bounds = array<i64: 1, 8, 256>}]} {
    %c0 = arith.constant 0 : index
    %c0_0 = arith.constant 0 : index
    %0 = vector.load %arg3[%c0, %c0_0] : memref<8x6xf32, #tpu.memory_space<vmem>>, vector<8x6xf32>
    %c0_1 = arith.constant 0 : index
    %c0_2 = arith.constant 0 : index
    %c0_3 = arith.constant 0 : index
    %1 = vector.load %arg1[%c0_1, %c0_2, %c0_3] : memref<1x6x256xf32, #tpu.memory_space<vmem>>, vector<1x6x256xf32>
    %2 = vector.shape_cast %1 : vector<1x6x256xf32> to vector<6x256xf32>
    %cst = arith.constant dense<0.000000e+00> : vector<8x256xf32>
    %3 = tpu.matmul %0, %2, %cst {dimension_numbers = #tpu.dot_dimension_numbers<[1], [0], [0], [1], [0, 0, 1, 1], [], []>, precision = #tpu.contract_precision<fp32>} : vector<8x6xf32>, vector<6x256xf32>, vector<8x256xf32> -> vector<8x256xf32>
    %c0_4 = arith.constant 0 : index
    %c0_5 = arith.constant 0 : index
    %4 = vector.load %arg4[%c0_4, %c0_5] : memref<8x1xf32, #tpu.memory_space<vmem>>, vector<8x1xf32>
    %5 = vector.broadcast %4 : vector<8x1xf32> to vector<8x256xf32>
    %6 = arith.addf %3, %5 : vector<8x256xf32>
    %c0_6 = arith.constant 0 : index
    %c0_7 = arith.constant 0 : index
    %c0_8 = arith.constant 0 : index
    %7 = vector.load %arg2[%c0_6, %c0_7, %c0_8] : memref<1x384x4xf32, #tpu.memory_space<vmem>>, vector<1x384x4xf32>
    %8 = vector.shape_cast %7 : vector<1x384x4xf32> to vector<384x4xf32>
    %c0_9 = arith.constant 0 : index
    %c0_10 = arith.constant 0 : index
    %9 = vector.load %arg5[%c0_9, %c0_10] : memref<8x384xf32, #tpu.memory_space<vmem>>, vector<8x384xf32>
    %cst_11 = arith.constant dense<0.000000e+00> : vector<8x4xf32>
    %10 = tpu.matmul %9, %8, %cst_11 {dimension_numbers = #tpu.dot_dimension_numbers<[1], [0], [0], [1], [0, 0, 1, 1], [], []>, precision = #tpu.contract_precision<fp32>} : vector<8x384xf32>, vector<384x4xf32>, vector<8x4xf32> -> vector<8x4xf32>
    %c0_12 = arith.constant 0 : index
    %c0_13 = arith.constant 0 : index
    %11 = vector.load %arg7[%c0_12, %c0_13] : memref<8x2xf32, #tpu.memory_space<vmem>>, vector<8x1xf32>
    %12 = vector.broadcast %11 : vector<8x1xf32> to vector<8x4xf32>
    %13 = arith.addf %10, %12 : vector<8x4xf32>
    %c0_14 = arith.constant 0 : index
    %c0_15 = arith.constant 0 : index
    %14 = vector.load %arg6[%c0_14, %c0_15] : memref<8x384xf32, #tpu.memory_space<vmem>>, vector<8x384xf32>
    %cst_16 = arith.constant dense<0.000000e+00> : vector<8x4xf32>
    %15 = tpu.matmul %14, %8, %cst_16 {dimension_numbers = #tpu.dot_dimension_numbers<[1], [0], [0], [1], [0, 0, 1, 1], [], []>, precision = #tpu.contract_precision<fp32>} : vector<8x384xf32>, vector<384x4xf32>, vector<8x4xf32> -> vector<8x4xf32>
    %c0_17 = arith.constant 0 : index
    %c1 = arith.constant 1 : index
    %16 = vector.load %arg7[%c0_17, %c1] : memref<8x2xf32, #tpu.memory_space<vmem>>, vector<8x1xf32>
    %17 = vector.broadcast %16 : vector<8x1xf32> to vector<8x4xf32>
    %18 = arith.addf %15, %17 : vector<8x4xf32>
    %19 = vector.extract_strided_slice %18 {offsets = [0, 0], sizes = [8, 1], strides = [1, 1]} : vector<8x4xf32> to vector<8x1xf32>
    %20 = vector.broadcast %19 : vector<8x1xf32> to vector<8x4xf32>
    %21 = arith.addf %13, %20 : vector<8x4xf32>
    %22 = vector.extract_strided_slice %18 {offsets = [0, 1], sizes = [8, 1], strides = [1, 1]} : vector<8x4xf32> to vector<8x1xf32>
    %23 = vector.broadcast %22 : vector<8x1xf32> to vector<8x4xf32>
    %24 = arith.addf %13, %23 : vector<8x4xf32>
    %25 = vector.extract_strided_slice %18 {offsets = [0, 2], sizes = [8, 1], strides = [1, 1]} : vector<8x4xf32> to vector<8x1xf32>
    %26 = vector.broadcast %25 : vector<8x1xf32> to vector<8x4xf32>
    %27 = arith.addf %13, %26 : vector<8x4xf32>
    %28 = vector.extract_strided_slice %18 {offsets = [0, 3], sizes = [8, 1], strides = [1, 1]} : vector<8x4xf32> to vector<8x1xf32>
    %29 = vector.broadcast %28 : vector<8x1xf32> to vector<8x4xf32>
    %30 = arith.addf %13, %29 : vector<8x4xf32>
    %31 = tpu.concatenate %21, %24, %27, %30 in 1 : vector<8x4xf32>, vector<8x4xf32>, vector<8x4xf32>, vector<8x4xf32> -> vector<8x16xf32>
    %cst_18 = arith.constant 0.000000e+00 : f32
    %32 = vector.broadcast %cst_18 : f32 to vector<8x16xf32>
    %33 = arith.cmpf oge, %31, %32 : vector<8x16xf32>
    %cst_19 = arith.constant 2.000000e-01 : f32
    %34 = vector.broadcast %cst_19 : f32 to vector<8x16xf32>
    %35 = arith.mulf %34, %31 : vector<8x16xf32>
    %36 = arith.select %33, %31, %35 : vector<8x16xi1>, vector<8x16xf32>
    %cst_20 = arith.constant dense<0xFF800000> : vector<16xf32>
    %37 = vector.multi_reduction <maximumf>, %36, %cst_20 [0] : vector<8x16xf32> to vector<16xf32>
    %38 = vector.shape_cast %37 : vector<16xf32> to vector<1x16xf32>
    %39 = vector.broadcast %38 : vector<1x16xf32> to vector<8x16xf32>
    %40 = arith.subf %36, %39 : vector<8x16xf32>
    %41 = math.exp %40 : vector<8x16xf32>
    %cst_21 = arith.constant dense<0.000000e+00> : vector<16xf32>
    %42 = vector.multi_reduction <add>, %41, %cst_21 [0] : vector<8x16xf32> to vector<16xf32>
    %43 = vector.shape_cast %42 : vector<16xf32> to vector<1x16xf32>
    %44 = tpu.reciprocal %43 : vector<1x16xf32> -> vector<1x16xf32>
    %45 = vector.broadcast %44 : vector<1x16xf32> to vector<8x16xf32>
    %46 = arith.mulf %41, %45 : vector<8x16xf32>
    %c0_22 = arith.constant 0 : index
    %c0_23 = arith.constant 0 : index
    %47 = vector.load %arg8[%c0_22, %c0_23] : memref<4x4xf32, #tpu.memory_space<vmem>>, vector<4x4xf32>
    %48 = vector.extract_strided_slice %46 {offsets = [0, 0], sizes = [8, 4], strides = [1, 1]} : vector<8x16xf32> to vector<8x4xf32>
    %cst_24 = arith.constant dense<0.000000e+00> : vector<8x4xf32>
    %49 = tpu.matmul %48, %47, %cst_24 {dimension_numbers = #tpu.dot_dimension_numbers<[1], [0], [0], [1], [0, 0, 1, 1], [], []>, precision = #tpu.contract_precision<fp32>} : vector<8x4xf32>, vector<4x4xf32>, vector<8x4xf32> -> vector<8x4xf32>
    %50 = vector.extract_strided_slice %46 {offsets = [0, 4], sizes = [8, 4], strides = [1, 1]} : vector<8x16xf32> to vector<8x4xf32>
    %cst_25 = arith.constant dense<0.000000e+00> : vector<8x4xf32>
    %51 = tpu.matmul %50, %47, %cst_25 {dimension_numbers = #tpu.dot_dimension_numbers<[1], [0], [0], [1], [0, 0, 1, 1], [], []>, precision = #tpu.contract_precision<fp32>} : vector<8x4xf32>, vector<4x4xf32>, vector<8x4xf32> -> vector<8x4xf32>
    %52 = vector.extract_strided_slice %46 {offsets = [0, 8], sizes = [8, 4], strides = [1, 1]} : vector<8x16xf32> to vector<8x4xf32>
    %cst_26 = arith.constant dense<0.000000e+00> : vector<8x4xf32>
    %53 = tpu.matmul %52, %47, %cst_26 {dimension_numbers = #tpu.dot_dimension_numbers<[1], [0], [0], [1], [0, 0, 1, 1], [], []>, precision = #tpu.contract_precision<fp32>} : vector<8x4xf32>, vector<4x4xf32>, vector<8x4xf32> -> vector<8x4xf32>
    %54 = vector.extract_strided_slice %46 {offsets = [0, 12], sizes = [8, 4], strides = [1, 1]} : vector<8x16xf32> to vector<8x4xf32>
    %cst_27 = arith.constant dense<0.000000e+00> : vector<8x4xf32>
    %55 = tpu.matmul %54, %47, %cst_27 {dimension_numbers = #tpu.dot_dimension_numbers<[1], [0], [0], [1], [0, 0, 1, 1], [], []>, precision = #tpu.contract_precision<fp32>} : vector<8x4xf32>, vector<4x4xf32>, vector<8x4xf32> -> vector<8x4xf32>
    %cst_28 = arith.constant 0.000000e+00 : f32
    %56 = vector.broadcast %cst_28 : f32 to vector<8x64xf32>
    %57 = vector.extract_strided_slice %49 {offsets = [0, 0], sizes = [8, 1], strides = [1, 1]} : vector<8x4xf32> to vector<8x1xf32>
    %58 = vector.extract_strided_slice %6 {offsets = [0, 0], sizes = [8, 64], strides = [1, 1]} : vector<8x256xf32> to vector<8x64xf32>
    %59 = vector.broadcast %57 : vector<8x1xf32> to vector<8x64xf32>
    %60 = arith.mulf %59, %58 : vector<8x64xf32>
    %61 = arith.addf %56, %60 : vector<8x64xf32>
    %62 = vector.extract_strided_slice %51 {offsets = [0, 0], sizes = [8, 1], strides = [1, 1]} : vector<8x4xf32> to vector<8x1xf32>
    %63 = vector.extract_strided_slice %6 {offsets = [0, 64], sizes = [8, 64], strides = [1, 1]} : vector<8x256xf32> to vector<8x64xf32>
    %64 = vector.broadcast %62 : vector<8x1xf32> to vector<8x64xf32>
    %65 = arith.mulf %64, %63 : vector<8x64xf32>
    %66 = arith.addf %61, %65 : vector<8x64xf32>
    %67 = vector.extract_strided_slice %53 {offsets = [0, 0], sizes = [8, 1], strides = [1, 1]} : vector<8x4xf32> to vector<8x1xf32>
    %68 = vector.extract_strided_slice %6 {offsets = [0, 128], sizes = [8, 64], strides = [1, 1]} : vector<8x256xf32> to vector<8x64xf32>
    %69 = vector.broadcast %67 : vector<8x1xf32> to vector<8x64xf32>
    %70 = arith.mulf %69, %68 : vector<8x64xf32>
    %71 = arith.addf %66, %70 : vector<8x64xf32>
    %72 = vector.extract_strided_slice %55 {offsets = [0, 0], sizes = [8, 1], strides = [1, 1]} : vector<8x4xf32> to vector<8x1xf32>
    %73 = vector.extract_strided_slice %6 {offsets = [0, 192], sizes = [8, 64], strides = [1, 1]} : vector<8x256xf32> to vector<8x64xf32>
    %74 = vector.broadcast %72 : vector<8x1xf32> to vector<8x64xf32>
    %75 = arith.mulf %74, %73 : vector<8x64xf32>
    %76 = arith.addf %71, %75 : vector<8x64xf32>
    %cst_29 = arith.constant 0.000000e+00 : f32
    %77 = vector.broadcast %cst_29 : f32 to vector<8x64xf32>
    %78 = vector.extract_strided_slice %49 {offsets = [0, 1], sizes = [8, 1], strides = [1, 1]} : vector<8x4xf32> to vector<8x1xf32>
    %79 = vector.extract_strided_slice %6 {offsets = [0, 0], sizes = [8, 64], strides = [1, 1]} : vector<8x256xf32> to vector<8x64xf32>
    %80 = vector.broadcast %78 : vector<8x1xf32> to vector<8x64xf32>
    %81 = arith.mulf %80, %79 : vector<8x64xf32>
    %82 = arith.addf %77, %81 : vector<8x64xf32>
    %83 = vector.extract_strided_slice %51 {offsets = [0, 1], sizes = [8, 1], strides = [1, 1]} : vector<8x4xf32> to vector<8x1xf32>
    %84 = vector.extract_strided_slice %6 {offsets = [0, 64], sizes = [8, 64], strides = [1, 1]} : vector<8x256xf32> to vector<8x64xf32>
    %85 = vector.broadcast %83 : vector<8x1xf32> to vector<8x64xf32>
    %86 = arith.mulf %85, %84 : vector<8x64xf32>
    %87 = arith.addf %82, %86 : vector<8x64xf32>
    %88 = vector.extract_strided_slice %53 {offsets = [0, 1], sizes = [8, 1], strides = [1, 1]} : vector<8x4xf32> to vector<8x1xf32>
    %89 = vector.extract_strided_slice %6 {offsets = [0, 128], sizes = [8, 64], strides = [1, 1]} : vector<8x256xf32> to vector<8x64xf32>
    %90 = vector.broadcast %88 : vector<8x1xf32> to vector<8x64xf32>
    %91 = arith.mulf %90, %89 : vector<8x64xf32>
    %92 = arith.addf %87, %91 : vector<8x64xf32>
    %93 = vector.extract_strided_slice %55 {offsets = [0, 1], sizes = [8, 1], strides = [1, 1]} : vector<8x4xf32> to vector<8x1xf32>
    %94 = vector.extract_strided_slice %6 {offsets = [0, 192], sizes = [8, 64], strides = [1, 1]} : vector<8x256xf32> to vector<8x64xf32>
    %95 = vector.broadcast %93 : vector<8x1xf32> to vector<8x64xf32>
    %96 = arith.mulf %95, %94 : vector<8x64xf32>
    %97 = arith.addf %92, %96 : vector<8x64xf32>
    %cst_30 = arith.constant 0.000000e+00 : f32
    %98 = vector.broadcast %cst_30 : f32 to vector<8x64xf32>
    %99 = vector.extract_strided_slice %49 {offsets = [0, 2], sizes = [8, 1], strides = [1, 1]} : vector<8x4xf32> to vector<8x1xf32>
    %100 = vector.extract_strided_slice %6 {offsets = [0, 0], sizes = [8, 64], strides = [1, 1]} : vector<8x256xf32> to vector<8x64xf32>
    %101 = vector.broadcast %99 : vector<8x1xf32> to vector<8x64xf32>
    %102 = arith.mulf %101, %100 : vector<8x64xf32>
    %103 = arith.addf %98, %102 : vector<8x64xf32>
    %104 = vector.extract_strided_slice %51 {offsets = [0, 2], sizes = [8, 1], strides = [1, 1]} : vector<8x4xf32> to vector<8x1xf32>
    %105 = vector.extract_strided_slice %6 {offsets = [0, 64], sizes = [8, 64], strides = [1, 1]} : vector<8x256xf32> to vector<8x64xf32>
    %106 = vector.broadcast %104 : vector<8x1xf32> to vector<8x64xf32>
    %107 = arith.mulf %106, %105 : vector<8x64xf32>
    %108 = arith.addf %103, %107 : vector<8x64xf32>
    %109 = vector.extract_strided_slice %53 {offsets = [0, 2], sizes = [8, 1], strides = [1, 1]} : vector<8x4xf32> to vector<8x1xf32>
    %110 = vector.extract_strided_slice %6 {offsets = [0, 128], sizes = [8, 64], strides = [1, 1]} : vector<8x256xf32> to vector<8x64xf32>
    %111 = vector.broadcast %109 : vector<8x1xf32> to vector<8x64xf32>
    %112 = arith.mulf %111, %110 : vector<8x64xf32>
    %113 = arith.addf %108, %112 : vector<8x64xf32>
    %114 = vector.extract_strided_slice %55 {offsets = [0, 2], sizes = [8, 1], strides = [1, 1]} : vector<8x4xf32> to vector<8x1xf32>
    %115 = vector.extract_strided_slice %6 {offsets = [0, 192], sizes = [8, 64], strides = [1, 1]} : vector<8x256xf32> to vector<8x64xf32>
    %116 = vector.broadcast %114 : vector<8x1xf32> to vector<8x64xf32>
    %117 = arith.mulf %116, %115 : vector<8x64xf32>
    %118 = arith.addf %113, %117 : vector<8x64xf32>
    %cst_31 = arith.constant 0.000000e+00 : f32
    %119 = vector.broadcast %cst_31 : f32 to vector<8x64xf32>
    %120 = vector.extract_strided_slice %49 {offsets = [0, 3], sizes = [8, 1], strides = [1, 1]} : vector<8x4xf32> to vector<8x1xf32>
    %121 = vector.extract_strided_slice %6 {offsets = [0, 0], sizes = [8, 64], strides = [1, 1]} : vector<8x256xf32> to vector<8x64xf32>
    %122 = vector.broadcast %120 : vector<8x1xf32> to vector<8x64xf32>
    %123 = arith.mulf %122, %121 : vector<8x64xf32>
    %124 = arith.addf %119, %123 : vector<8x64xf32>
    %125 = vector.extract_strided_slice %51 {offsets = [0, 3], sizes = [8, 1], strides = [1, 1]} : vector<8x4xf32> to vector<8x1xf32>
    %126 = vector.extract_strided_slice %6 {offsets = [0, 64], sizes = [8, 64], strides = [1, 1]} : vector<8x256xf32> to vector<8x64xf32>
    %127 = vector.broadcast %125 : vector<8x1xf32> to vector<8x64xf32>
    %128 = arith.mulf %127, %126 : vector<8x64xf32>
    %129 = arith.addf %124, %128 : vector<8x64xf32>
    %130 = vector.extract_strided_slice %53 {offsets = [0, 3], sizes = [8, 1], strides = [1, 1]} : vector<8x4xf32> to vector<8x1xf32>
    %131 = vector.extract_strided_slice %6 {offsets = [0, 128], sizes = [8, 64], strides = [1, 1]} : vector<8x256xf32> to vector<8x64xf32>
    %132 = vector.broadcast %130 : vector<8x1xf32> to vector<8x64xf32>
    %133 = arith.mulf %132, %131 : vector<8x64xf32>
    %134 = arith.addf %129, %133 : vector<8x64xf32>
    %135 = vector.extract_strided_slice %55 {offsets = [0, 3], sizes = [8, 1], strides = [1, 1]} : vector<8x4xf32> to vector<8x1xf32>
    %136 = vector.extract_strided_slice %6 {offsets = [0, 192], sizes = [8, 64], strides = [1, 1]} : vector<8x256xf32> to vector<8x64xf32>
    %137 = vector.broadcast %135 : vector<8x1xf32> to vector<8x64xf32>
    %138 = arith.mulf %137, %136 : vector<8x64xf32>
    %139 = arith.addf %134, %138 : vector<8x64xf32>
    %140 = tpu.concatenate %76, %97, %118, %139 in 1 : vector<8x64xf32>, vector<8x64xf32>, vector<8x64xf32>, vector<8x64xf32> -> vector<8x256xf32>
    %cst_32 = arith.constant 0.000000e+00 : f32
    %141 = vector.broadcast %cst_32 : f32 to vector<8x256xf32>
    %142 = arith.cmpf ogt, %140, %141 : vector<8x256xf32>
    %143 = math.exp %140 : vector<8x256xf32>
    %cst_33 = arith.constant 1.000000e+00 : f32
    %144 = vector.broadcast %cst_33 : f32 to vector<8x256xf32>
    %145 = arith.subf %143, %144 : vector<8x256xf32>
    %146 = arith.select %142, %140, %145 : vector<8x256xi1>, vector<8x256xf32>
    %c0_34 = arith.constant 0 : index
    %c0_35 = arith.constant 0 : index
    %c0_36 = arith.constant 0 : index
    %147 = vector.load %arg9[%c0_34, %c0_35, %c0_36] : memref<1x8x256xf32, #tpu.memory_space<vmem>>, vector<1x8x256xf32>
    %148 = vector.shape_cast %147 : vector<1x8x256xf32> to vector<8x256xf32>
    %149 = vector.shape_cast %146 : vector<8x256xf32> to vector<1x8x256xf32>
    tpu.vector_store %arg9[%c0_34, %c0_35, %c0_36], %149 {strides = array<i32>} : memref<1x8x256xf32, #tpu.memory_space<vmem>>, vector<1x8x256xf32>,
    return
  }
  func.func @transform_0(%arg0: i32) -> (i32, i32, i32) {
    %c0_i32 = arith.constant 0 : i32
    %c0_i32_0 = arith.constant 0 : i32
    %c0_i32_1 = arith.constant 0 : i32
    return %arg0, %c0_i32, %c0_i32_0 : i32, i32, i32
  }
  func.func @transform_1(%arg0: i32) -> (i32, i32, i32) {
    %c0_i32 = arith.constant 0 : i32
    %c0_i32_0 = arith.constant 0 : i32
    %c0_i32_1 = arith.constant 0 : i32
    return %arg0, %c0_i32, %c0_i32_0 : i32, i32, i32
  }
  func.func @transform_2(%arg0: i32) -> (i32, i32) {
    %c0_i32 = arith.constant 0 : i32
    %c0_i32_0 = arith.constant 0 : i32
    %c0_i32_1 = arith.constant 0 : i32
    return %c0_i32, %c0_i32_0 : i32, i32
  }
  func.func @transform_3(%arg0: i32) -> (i32, i32) {
    %c0_i32 = arith.constant 0 : i32
    %c0_i32_0 = arith.constant 0 : i32
    %c0_i32_1 = arith.constant 0 : i32
    return %c0_i32, %c0_i32_0 : i32, i32
  }
  func.func @transform_4(%arg0: i32) -> (i32, i32) {
    %c0_i32 = arith.constant 0 : i32
    %c0_i32_0 = arith.constant 0 : i32
    %c0_i32_1 = arith.constant 0 : i32
    return %c0_i32, %c0_i32_0 : i32, i32
  }
  func.func @transform_5(%arg0: i32) -> (i32, i32) {
    %c0_i32 = arith.constant 0 : i32
    %c0_i32_0 = arith.constant 0 : i32
    %c0_i32_1 = arith.constant 0 : i32
    return %c0_i32, %c0_i32_0 : i32, i32
  }
  func.func @transform_6(%arg0: i32) -> (i32, i32) {
    %c0_i32 = arith.constant 0 : i32
    %c0_i32_0 = arith.constant 0 : i32
    %c0_i32_1 = arith.constant 0 : i32
    return %c0_i32, %c0_i32_0 : i32, i32
  }
  func.func @transform_7(%arg0: i32) -> (i32, i32) {
    %c0_i32 = arith.constant 0 : i32
    %c0_i32_0 = arith.constant 0 : i32
    %c0_i32_1 = arith.constant 0 : i32
    return %c0_i32, %c0_i32_0 : i32, i32
  }
  func.func @transform_8(%arg0: i32) -> (i32, i32, i32) {
    %c0_i32 = arith.constant 0 : i32
    %c0_i32_0 = arith.constant 0 : i32
    %c0_i32_1 = arith.constant 0 : i32
    return %arg0, %c0_i32, %c0_i32_0 : i32, i32, i32
  }
}

</mosaic_0001>

<bundles_post_ra>
// kernel: tpu_custom_call.1
= control target key start
LH: loop header
LB: loop body
LE: loop exit
PB: predicated region body
PF: predicated region fallthrough
CT: control target
= control target key end

     0   :  { %13 = vsyncpa [#allocation3], 0  ;;  %s9896_s0 = inlined_call_operand.vmem [shape: f32[2,6,256], index: 0, kind: input, shape index: {}]   ;;  %s9897_s1 = inlined_call_operand.vmem [shape: f32[2,384,4], index: 1, kind: input, shape index: {}]   ;;  %s9898_s2 = inlined_call_operand.vmem [shape: f32[8,6], index: 2, kind: input, shape index: {}]   ;;  %s9899_s3 = inlined_call_operand.vmem [shape: f32[8,1], index: 3, kind: input, shape index: {}]   ;;  %s9900_s4 = inlined_call_operand.vmem [shape: f32[8,384], index: 4, kind: input, shape index: {}]   ;;  %s9901_s5 = inlined_call_operand.vmem [shape: f32[8,384], index: 5, kind: input, shape index: {}]   ;;  %s9902_s6 = inlined_call_operand.vmem [shape: f32[8,2], index: 6, kind: input, shape index: {}]   ;;  %s9903_s7 = inlined_call_operand.vmem [shape: f32[4,4], index: 7, kind: input, shape index: {}]   ;;  %s9904_s8 = inlined_call_operand.hbm [shape: f32[2,8,256], index: 8, kind: output, shape index: {}]  }
   0x1   :  { %15 = vsyncpa [#allocation3 + $0x1], 0  ;;  %s8169_s27 = smov 0   ;;  %s8171_s28 = smov 0  }
   0x2   :  { %s8173_s29 = smov 0   ;;  %s8175_s30 = smov 0  }
   0x3 LB: > { %s8190_s9 = sadd.s32 4294967295, %s8107_s30   ;;  %s5986_s10 = sadd.s32 4294967294, %s8107_s30   ;;  %s8107_s30 = sphi %s8175_s30, %s10330_s30   ;;  %s8103_s29 = sphi %s8173_s29, %s10329_s29   ;;  %s8099_s28 = sphi %s8171_s28, %s10328_s28   ;;  %s8095_s27 = sphi %s8169_s27, %s10327_s27  }
   0x4   : > { %s8194_s11 = sadd.s32 1, %s8107_s30   ;;  %s206_s12 = sadd.s32 1, %s8103_s29 }
   0x5   : > { %s203_s13 = ssub.s32 %s8107_s30, %s8194_s11  ;;  %p216_p0 = scmp.ne.s32.totalorder %s8103_s29, %s8099_s28 }
   0x6   : > { %p204_p1 = scmp.eq.s32.totalorder %s203_s13, 0  ;;  %p217_p2 = scmp.eq.s32.totalorder %s8190_s9, 1 }
   0x7   : > { %p222_p3 = scmp.ne.s32.totalorder %s8099_s28, %s8095_s27  ;;  %p223_p4 = scmp.eq.s32.totalorder %s5986_s10, 1 }
   0x8   : > { %s8205_s14 = scalar_select %p204_p1, %s8103_s29, %s206_s12  }
   0x9   : > { %p8207_p5 = por %p217_p2, %p216_p0  ;;  %p8211_p6 = por %p223_p4, %p222_p3 }
   0xa   : > { %p5989_p7 = scmp.ge.s32.totalorder %s8107_s30, 1  ;;  %p275_p8 = scmp.lt.s32.totalorder %s8107_s30, 3 }
   0xc   : > { %p276_p9 = pnand %p5989_p7, %p275_p8 }
   0xe   : > { %279 = sbr.rel (%p276_p9) target bundleno = 1878 (0x756), region = 52 }
  0x15   : > { %p314_p10 = scmp.lt.s32.totalorder %s8190_s9, 1  ;;  %v324_v0 = vld [vmem:[%s9898_s2] sm:$0xff]  ;;  %vm333_vm0 = vcmask 48128   ;;  %v858_v1 = vld [vmem:[%s9900_s4 + $0x8] sm:$0xff]  ;;  %v9925_v2 = vmov 0.0   ;;  %vm337_vm1 = vcmask 1045504  }
  0x16   : > { %410 = vmatprep.mubr.f32.mxu0 %v9925_v2  ;;  %v335_v3 = vsel %vm333_vm0, %v324_v0, 0  ;;  %v8225_v4 = vand.u32 4294901760, %v858_v1  ;;  %vm8112_vm2 = vmmov 0   ;;  %s8117_s17 = smov 8   ;;  %s8118_s18 = smov 12   ;;  %vm3945_vm3 = vcmask 1043456  }
  0x17   : > { %s315_s21 = scalar_select %p314_p10, %s8190_s9, 1  ;;  %v8228_v5 = vand.u32 4294901760, %v335_v3  ;;  %vm3912_vm4 = vcmask 31744   ;;  %vm3914_vm5 = vcmask 64512   ;;  %vm3916_vm6 = vcmask 97280  }
  0x18   : > { %10054 = vst [vmem:[#allocation5_spill] sm:$0xff] %v8225_v4  ;;  %v8231_v6 = vsub.f32 %v858_v1, %v8225_v4  ;;  %vm3921_vm7 = vcmask 130048   ;;  %s8121_s25 = smov 116   ;;  %vm5885_vm9 = vcmask 523264   ;;  %s311_s10 = sand.u32 1, %s8099_s28  }
  0x19   : > { %s6001_s22 = sshll.u32 %s315_s21, 4  ;;  %s7961_s23 = smul.u32 384, %s315_s21  ;;  %v8234_v7 = vsub.f32 %v335_v3, %v8228_v5 }
  0x1a   : > { %10055 = vst [vmem:[#allocation6_spill] sm:$0xff] %v8231_v6  ;;  %s318_s26 = scalar_lea.vmem %s9896_s0, %s6001_s22  ;;  %1340 = vmatprep.mubr.f32.mxu1 %v8231_v6  ;;  %s8119_s21 = smov 120  }
  0x1b   : > { %s8243_s13 = scalar_lea.vmem %s9897_s1, %s7961_s23  ;;  %v326_v8 = vld [vmem:[%s318_s26 + $0x8] sm:$0x3f]  ;;  %v325_v9 = vld [vmem:[%s318_s26] sm:$0x3f]  ;;  %v9923_v10 = vand.u32 4294901760, %v8234_v7  ;;  %s8120_s22 = smov 124  }
  0x1c   : > { %v342_v11 = vsel %vm337_vm1, %v326_v8, 0  ;;  %v339_v12 = vsel %vm337_vm1, %v325_v9, 0  ;;  %v8247_v13 = vld [vmem:[%s8243_s13 + $0x80] sm:$0xff]  ;;  %v8250_v14 = vld [vmem:[%s8243_s13 + $0x88] sm:$0xff]  ;;  %v8267_v21 = vld [vmem:[%s8243_s13 + $0x90] sm:$0xff]  ;;  %s8122_s26 = smov 64  }
  0x1d   : > { %v8253_v15 = vld [vmem:[%s8243_s13] sm:$0xff]  ;;  %v8255_v16 = vand.u32 4294901760, %v342_v11  ;;  %v8257_v17 = vand.u32 4294901760, %v339_v12  ;;  %v414_v18 = vsub.f32 %v8234_v7, %v9923_v10  ;;  %v9920_v19 = vand.u32 4294901760, %v8247_v13  ;;  %v8264_v20 = vld [vmem:[%s8243_s13 + $0x8] sm:$0xff]  ;;  %v8273_v25 = vld [vmem:[%s8243_s13 + $0x98] sm:$0xff] }
  0x1e   : > { %v9918_v22 = vand.u32 4294901760, %v8250_v14  ;;  %v9916_v23 = vand.u32 4294901760, %v8253_v15  ;;  %v9915_v24 = vand.u32 4294901760, %v8264_v20  ;;  %v9914_v26 = vand.u32 4294901760, %v8267_v21  ;;  %v8289_v31 = vld [vmem:[%s8243_s13 + $0x10] sm:$0xff]  ;;  %v8292_v32 = vld [vmem:[%s8243_s13 + $0x18] sm:$0xff] }
  0x1f   : > { %10056 = vst [vmem:[#allocation7_spill] sm:$0xff] %v8257_v17  ;;  %345 = vmatprep.subr.mxu0 %v8255_v16  ;;  %v8278_v27 = vsub.f32 %v339_v12, %v8257_v17  ;;  %v415_v28 = vand.u32 4294901760, %v414_v18  ;;  %v8283_v29 = vsub.f32 %v8247_v13, %v9920_v19  ;;  %v8286_v30 = vsub.f32 %v342_v11, %v8255_v16  ;;  %v8326_v43 = vld [vmem:[%s8243_s13 + $0xa0] sm:$0xff]  ;;  %v8329_v44 = vld [vmem:[%s8243_s13 + $0xa8] sm:$0xff]  ;;  %v8364_v53 = vld [vmem:[%s8243_s13 + $0xb0] sm:$0xff]  ;;  %s5990_s12 = sshll.u32 %s311_s10, 4 }
  0x20   : > { %347 = vmatpush1.msra.mxu0 %v8257_v17  ;;  %v8298_v33 = vsub.f32 %v8250_v14, %v9918_v22  ;;  %v8303_v34 = vsub.f32 %v8253_v15, %v9916_v23  ;;  %v8308_v35 = vsub.f32 %v8264_v20, %v9915_v24  ;;  %v9913_v37 = vand.u32 4294901760, %v8273_v25  ;;  %v8344_v48 = vld [vmem:[%s8243_s13 + $0x20] sm:$0xff]  ;;  %v8347_v49 = vld [vmem:[%s8243_s13 + $0x28] sm:$0xff]  ;;  %v8374_v58 = vld [vmem:[%s8243_s13 + $0xb8] sm:$0xff]  ;;  %s8123_s23 = smov [#allocation2]  }
  0x21   : > { %416 = vmatmul.mubr.f32.vlgmr.msra.gmra.mrb[0].mxu0 %v415_v28  ;;  %v9924_v36 = vand.u32 4294901760, %v8286_v30  ;;  %v8315_v38 = vsub.f32 %v8267_v21, %v9914_v26  ;;  %v9921_v40 = vand.u32 4294901760, %v8278_v27  ;;  %v9911_v41 = vand.u32 4294901760, %v8289_v31  ;;  %v8383_v63 = vld [vmem:[%s8243_s13 + $0x30] sm:$0xff]  ;;  %v8386_v0 = vld [vmem:[%s8243_s13 + $0x38] sm:$0xff]  ;;  %v8401_v9 = vld [vmem:[%s8243_s13 + $0xc0] sm:$0xff] }
  0x22   : > { %v8319_v39 = vpack.c.bf16 %v8298_v33, %v8283_v29  ;;  %496 = vmatprep.mubr.f32.mxu0 %v9925_v2  ;;  %v9910_v42 = vand.u32 4294901760, %v8292_v32  ;;  %v8333_v45 = vpack.c.bf16 %v8308_v35, %v8303_v34  ;;  %v8341_v47 = vsub.f32 %v8273_v25, %v9913_v37  ;;  %v8415_v28 = vld [vmem:[%s8243_s13 + $0xc8] sm:$0xff]  ;;  %v8465_v26 = vld [vmem:[%s8243_s13 + $0xd8] sm:$0xff]  ;;  %s8049_s24 = sshll.u32 %s8123_s23, 4  ;;  %s8050_s24 = int_to_ptr.vmem [resolvable:$false] %s8049_s24 }
  0x23   : > { %v425_v46 = vsub.f32 %v8286_v30, %v9924_v36  ;;  %v431_v50 = vsub.f32 %v8278_v27, %v9921_v40  ;;  %v8356_v51 = vsub.f32 %v8289_v31, %v9911_v41  ;;  %v9909_v56 = vand.u32 4294901760, %v8326_v43  ;;  %10064 = vst [vmem:[#allocation15_spill] sm:$0xff] %v8465_v26  ;;  %v8483_v19 = vld [vmem:[%s8243_s13 + $0x58] sm:$0xff]  ;;  %v8497_v36 = vld [vmem:[%s8243_s13 + $0xe0] sm:$0xff] }
  0x24   : > { %10057 = vst [vmem:[#allocation8_spill] sm:$0xff] %v8319_v39  ;;  %10058 = vst [vmem:[#allocation9_spill] sm:$0xff] %v8333_v45  ;;  %7280 = vmatprep.subr.bf16.mxu1 %v8319_v39  ;;  %v8361_v52 = vsub.f32 %v8292_v32, %v9910_v42  ;;  %v8369_v55 = vpack.c.bf16 %v8341_v47, %v8315_v38  ;;  %v9907_v57 = vand.u32 4294901760, %v8329_v44  ;;  %v9906_v61 = vand.u32 4294901760, %v8344_v48  ;;  %v8449_v42 = vld [vmem:[%s8243_s13 + $0xd0] sm:$0xff] }
  0x25   : > { %7282 = vmatpush3.bf16.msra.mxu1 %v8333_v45  ;;  %v426_v54 = vand.u32 4294901760, %v425_v46  ;;  %v432_v59 = vand.u32 4294901760, %v431_v50  ;;  %v9905_v62 = vand.u32 4294901760, %v8347_v49  ;;  %v8392_v1 = vsub.f32 %v8326_v43, %v9909_v56  ;;  %10063 = vst [vmem:[#allocation14_spill] sm:$0xff] %v8449_v42  ;;  %10068 = vst [vmem:[#allocation19_spill] sm:$0xff] %v8483_v19  ;;  %v8529_v45 = vld [vmem:[%s8243_s13 + $0x68] sm:$0xff] }
  0x26   : > { %10059 = vst [vmem:[#allocation10_spill] sm:$0xff] %v8369_v55  ;;  %v8378_v60 = vpack.c.bf16 %v8361_v52, %v8356_v51  ;;  %7284 = vmatprep.subr.bf16.mxu1 %v8369_v55  ;;  %v8397_v3 = vsub.f32 %v8329_v44, %v9907_v57  ;;  %v9908_v8 = vand.u32 4294901760, %v8364_v53  ;;  %v8406_v11 = vsub.f32 %v8344_v48, %v9906_v61  ;;  %v8434_v61 = vld [vmem:[%s8243_s13 + $0x48] sm:$0xff] }
  0x27   : > { %427 = vmatprep.subr.mxu0 %v426_v54  ;;  %v8411_v12 = vsub.f32 %v8347_v49, %v9905_v62  ;;  %v9912_v18 = vand.u32 4294901760, %v8374_v58  ;;  %v9917_v54 = vand.u32 4294901760, %v8383_v63  ;;  %v8431_v62 = vld [vmem:[%s8243_s13 + $0x40] sm:$0xff]  ;;  %v9922_v56 = vand.u32 4294901760, %v8401_v9  ;;  %10071 = vst [vmem:[#allocation22_spill] sm:$0xff] %v8497_v36  ;;  %10079 = vst [vmem:[#allocation29_spill] sm:$0xff] %v8529_v45 }
  0x28   : > { %10060 = vst [vmem:[#allocation11_spill] sm:$0xff] %v8378_v60  ;;  %433 = vmatpush1.msra.mxu0 %v432_v59  ;;  %v8421_v46 = vpack.c.bf16 %v8397_v3, %v8392_v1  ;;  %v8426_v50 = vsub.f32 %v8364_v53, %v9908_v8  ;;  %v9919_v59 = vand.u32 4294901760, %v8386_v0  ;;  %v9928_v37 = vand.u32 4294901760, %v8415_v28 }
  0x29   : > { %7286 = vmatpush3.bf16.msra.mxu1 %v8378_v60  ;;  %498 = vmatmul.mubr.f32.vlgmr.msra.gmra.mrb[0].mxu0 %v8228_v5  ;;  %v8438_v57 = vpack.c.bf16 %v8411_v12, %v8406_v11  ;;  %v8444_v8 = vsub.f32 %v8374_v58, %v9912_v18  ;;  %v8456_v41 = vsub.f32 %v8383_v63, %v9917_v54  ;;  %v9932_v54 = vand.u32 4294901760, %v8431_v62 }
  0x2a   : > { %10061 = vst [vmem:[#allocation12_spill] sm:$0xff] %v8421_v46  ;;  %506 = vmatprep.subr.mxu0 %v8286_v30  ;;  %572 = vmatprep.mubr.f32.mxu0 %v9925_v2  ;;  %v8461_v18 = vsub.f32 %v8386_v0, %v9919_v59  ;;  %v8474_v23 = vsub.f32 %v8401_v9, %v9922_v56  ;;  %v9934_v22 = vand.u32 4294901760, %v8434_v61  ;;  %v8480_v59 = vld [vmem:[%s8243_s13 + $0x50] sm:$0xff] }
  0x2b   : > { %10062 = vst [vmem:[#allocation13_spill] sm:$0xff] %v8438_v57  ;;  %7288 = vmatprep.subr.bf16.mxu1 %v8421_v46  ;;  %509 = vmatpush1.msra.mxu0 %v8278_v27  ;;  %v8469_v24 = vpack.c.bf16 %v8444_v8, %v8426_v50  ;;  %10067 = vst [vmem:[#allocation18_spill] sm:$0xff] %v8480_v59  ;;  %v8493_v56 = vsub.f32 %v8415_v28, %v9928_v37  ;;  %v9941_v37 = vand.u32 4294901760, %v8465_v26  ;;  %v8512_v46 = vld [vmem:[%s8243_s13 + $0xe8] sm:$0xff] }
  0x2c   : > { %10066 = vst [vmem:[#allocation17_spill] sm:$0xff] %v8474_v23  ;;  %582 = vmatprep.subr.mxu0 %v8255_v16  ;;  %v8488_v40 = vpack.c.bf16 %v8461_v18, %v8456_v41  ;;  %v8503_v2 = vsub.f32 %v8431_v62, %v9932_v54  ;;  %10074 = vst [vmem:[#allocation25_spill] sm:$0xff] %v8512_v46  ;;  %v9948_v54 = vand.u32 4294901760, %v8480_v59 }
  0x2d   : > { %10065 = vst [vmem:[#allocation16_spill] sm:$0xff] %v8469_v24  ;;  %7290 = vmatpush3.bf16.msra.mxu1 %v8438_v57  ;;  %10070 = vst [vmem:[#allocation21_spill] sm:$0xff] %v8493_v56  ;;  %v8508_v57 = vsub.f32 %v8434_v61, %v9934_v22  ;;  %v8516_v10 = vpack.c.bf16 %v8493_v56, %v8474_v23  ;;  %v8526_v22 = vld [vmem:[%s8243_s13 + $0x60] sm:$0xff]  ;;  %v8534_v39 = vsub.f32 %v8465_v26, %v9941_v37  ;;  %v8538_v56 = vld [vmem:[%s8243_s13 + $0xf0] sm:$0xff] }
  0x2e   : > { %10069 = vst [vmem:[#allocation20_spill] sm:$0xff] %v8488_v40  ;;  %7292 = vmatprep.subr.bf16.mxu1 %v8469_v24  ;;  %10072 = vst [vmem:[#allocation23_spill] sm:$0xff] %v8503_v2  ;;  %v10076_v24 = vand.u32 4294901760, %v8449_v42  ;;  %v8549_v55 = vsub.f32 %v8480_v59, %v9948_v54  ;;  %v10083_v37 = vand.u32 4294901760, %v8483_v19  ;;  %v8558_v26 = vld [vmem:[%s8243_s13 + $0xf8] sm:$0xff]  ;;  %v10086_v54 = vand.u32 4294901760, %v8497_v36 }
  0x2f   : > { %10073 = vst [vmem:[#allocation24_spill] sm:$0xff] %v8508_v57  ;;  %10075 = vst [vmem:[#allocation26_spill] sm:$0xff] %v8516_v10  ;;  %v8580_v59 = vld [vmem:[%s8243_s13 + $0x78] sm:$0xff] }
  0x30   : > { %v8521_v60 = vsub.f32 %v8449_v42, %v10076_v24  ;;  %10078 = vst [vmem:[#allocation28_spill] sm:$0xff] %v8526_v22  ;;  %10080 = vst [vmem:[#allocation30_spill] sm:$0xff] %v8534_v39  ;;  %v8544_v24 = vpack.c.bf16 %v8508_v57, %v8503_v2  ;;  %v8554_v4 = vsub.f32 %v8483_v19, %v10083_v37  ;;  %v8577_v19 = vld [vmem:[%s8243_s13 + $0x70] sm:$0xff]  ;;  %v10094_v42 = vand.u32 4294901760, %v8526_v22 }
  0x31   : > { %10081 = vst [vmem:[#allocation31_spill] sm:$0xff] %v8538_v56  ;;  %7294 = vmatpush3.bf16.msra.mxu1 %v8488_v40  ;;  %575 = vmatmul.mubr.f32.vlgmr.msra.gmra.mrb[0].mxu0 %v8234_v7  ;;  %10084 = vst [vmem:[#allocation33_spill] sm:$0xff] %v8558_v26  ;;  %v857_v40 = vld [vmem:[%s9900_s4] sm:$0xff]  ;;  %v8572_v37 = vsub.f32 %v8497_v36, %v10086_v54 }
  0x32   : > { %10077 = vst [vmem:[#allocation27_spill] sm:$0xff] %v8521_v60  ;;  %10082 = vst [vmem:[#allocation32_spill] sm:$0xff] %v8544_v24  ;;  %7296 = vmatprep.subr.bf16.mxu1 %v8516_v10  ;;  %v8566_v57 = vpack.c.bf16 %v8534_v39, %v8521_v60  ;;  %584 = vmatpush1.msra.mxu0 %v8257_v17  ;;  %v10089_v10 = vmov 0.0   ;;  %v10090_v39 = vand.u32 4294901760, %v8512_v46  ;;  %v10091_v17 = vand.u32 4294901760, %v8286_v30 }
  0x33   : > { %10087 = vst [vmem:[#allocation35_spill] sm:$0xff] %v8577_v19  ;;  %10088 = vst [vmem:[#allocation36_spill] sm:$0xff] %v8580_v59  ;;  %647 = vmatprep.mubr.f32.mxu0 %v10089_v10  ;;  %v8593_v23 = vpack.c.bf16 %v8554_v4, %v8549_v55  ;;  %v8596_v36 = vand.u32 4294901760, %v857_v40  ;;  %v10095_v30 = vand.u32 4294901760, %v8529_v45 }
  0x34   : > { %10085 = vst [vmem:[#allocation34_spill] sm:$0xff] %v8566_v57  ;;  %v8586_v60 = vsub.f32 %v8512_v46, %v10090_v39  ;;  %660 = vmatprep.subr.mxu0 %v10091_v17  ;;  %v8602_v39 = vsub.f32 %v8526_v22, %v10094_v42  ;;  %v10099_v22 = vand.u32 4294901760, %v8558_v26 }
  0x35   : > { %10092 = vst [vmem:[#allocation37_spill] sm:$0xff] %v8593_v23  ;;  %10093 = vst [vmem:[#allocation38_spill] sm:$0xff] %v8596_v36  ;;  %7298 = vmatpush3.bf16.msra.mxu1 %v8544_v24  ;;  %v8607_v17 = vsub.f32 %v8529_v45, %v10095_v30  ;;  %v10097_v24 = vand.u32 4294901760, %v8538_v56  ;;  %v8628_v46 = vsub.f32 %v857_v40, %v8596_v36  ;;  %v10108_v40 = vand.u32 4294901760, %v8278_v27 }
  0x36   : > { %7300 = vmatprep.subr.bf16.mxu1 %v8566_v57  ;;  %v8614_v2 = vpack.c.bf16 %v8586_v60, %v8572_v37  ;;  %v8624_v30 = vsub.f32 %v8558_v26, %v10099_v22  ;;  %v10102_v57 = vand.u32 4294901760, %v8234_v7  ;;  %v10105_v22 = vand.u32 4294901760, %v8580_v59 }
  0x37   : > { %v8619_v42 = vsub.f32 %v8538_v56, %v10097_v24  ;;  %10101 = vst [vmem:[#allocation42_spill] sm:$0xff] %v8628_v46  ;;  %v8635_v45 = vpack.c.bf16 %v8607_v17, %v8602_v39  ;;  %v10104_v24 = vand.u32 4294901760, %v8577_v19  ;;  %v10114_v27 = vand.u32 4294901760, %v8264_v20 }
  0x38   : > { %10096 = vst [vmem:[#allocation39_spill] sm:$0xff] %v8614_v2  ;;  %10100 = vst [vmem:[#allocation41_spill] sm:$0xff] %v8624_v30  ;;  %v8645_v54 = vsub.f32 %v8580_v59, %v10105_v22  ;;  %v10110_v22 = vand.u32 4294901760, %v8247_v13  ;;  %v10115_v26 = vand.u32 4294901760, %v8267_v21  ;;  %v10117_v13 = vand.u32 4294901760, %v8289_v31 }
  0x39   : > { %10098 = vst [vmem:[#allocation40_spill] sm:$0xff] %v8619_v42  ;;  %7302 = vmatpush3.bf16.msra.mxu1 %v8593_v23  ;;  %651 = vmatmul.mubr.f32.vlgmr.msra.gmra.mrb[0].mxu0 %v10102_v57  ;;  %10103 = vst [vmem:[#allocation43_spill] sm:$0xff] %v8635_v45  ;;  %v8640_v56 = vsub.f32 %v8577_v19, %v10104_v24  ;;  %v8650_v7 = vpack.c.bf16 %v8624_v30, %v8619_v42  ;;  %v1093_v57 = vand.u32 4294901760, %v8283_v29 }
  0x3a   : > { %10106 = vst [vmem:[#allocation44_spill] sm:$0xff] %v8645_v54  ;;  %7304 = vmatprep.subr.bf16.mxu1 %v8614_v2  ;;  %664 = vmatpush1.msra.mxu0 %v10108_v40  ;;  %v1100_v23 = vand.u32 4294901760, %v8298_v33  ;;  %v10109_v24 = vand.u32 4294901760, %v8231_v6  ;;  %v10111_v2 = vand.u32 4294901760, %v8250_v14  ;;  %v10113_v19 = vand.u32 4294901760, %v8253_v15 }
  0x3b   : > { %10107 = vst [vmem:[#allocation45_spill] sm:$0xff] %v8650_v7  ;;  %v10116_v30 = vand.u32 4294901760, %v8273_v25  ;;  %727 = vmatprep.mubr.f32.mxu0 %v10089_v10  ;;  %736 = vmatprep.subr.mxu0 %v8255_v16  ;;  %v10119_v15 = vand.u32 4294901760, %v8326_v43  ;;  %v10121_v21 = vand.u32 4294901760, %v8344_v48  ;;  %v10122_v25 = vand.u32 4294901760, %v8347_v49 }
  0x3c   : > { %v8659_v36 = vsub.f32 %v8231_v6, %v10109_v24  ;;  %v8665_v59 = vpack.c.bf16 %v10111_v2, %v10110_v22  ;;  %v8671_v40 = vpack.c.bf16 %v10114_v27, %v10113_v19  ;;  %v10118_v2 = vand.u32 4294901760, %v8292_v32  ;;  %v10146_v6 = vld [vmem:[#allocation19_spill] sm:$0xff] }
  0x3d   : > { %v8677_v42 = vpack.c.bf16 %v10116_v30, %v10115_v26  ;;  %v10120_v19 = vand.u32 4294901760, %v8329_v44  ;;  %v8697_v26 = vpack.c.bf16 %v10122_v25, %v10121_v21  ;;  %v10123_v16 = vand.u32 4294901760, %v8364_v53  ;;  %7306 = vmatpush3.bf16.msra.mxu1 %v8635_v45  ;;  %v10144_v45 = vld [vmem:[#allocation18_spill] sm:$0xff] }
  0x3e   : > { %10112 = vst [vmem:[#allocation46_spill] sm:$0xff] %v8665_v59  ;;  %v8685_v14 = vpack.c.bf16 %v10118_v2, %v10117_v13  ;;  %v10124_v31 = vand.u32 4294901760, %v8374_v58  ;;  %v10125_v32 = vand.u32 4294901760, %v8383_v63  ;;  %v10126_v43 = vand.u32 4294901760, %v8386_v0  ;;  %7308 = vmatprep.subr.bf16.mxu1 %v8650_v7 }
  0x3f   : > { %v8691_v20 = vpack.c.bf16 %v10120_v19, %v10119_v15  ;;  %v8714_v44 = vpack.c.bf16 %v8645_v54, %v8640_v56  ;;  %v981_v48 = vand.u32 4294901760, %v8303_v34  ;;  %v988_v49 = vand.u32 4294901760, %v8308_v35  ;;  %v10135_v19 = vld [vmem:[#allocation14_spill] sm:$0xff] }
  0x40   : > { %v8703_v30 = vpack.c.bf16 %v10124_v31, %v10123_v16  ;;  %v8709_v24 = vpack.c.bf16 %v10126_v43, %v10125_v32  ;;  %v10128_v53 = vand.u32 4294901760, %v8401_v9  ;;  %v10129_v58 = vand.u32 4294901760, %v8415_v28  ;;  %v10137_v28 = vld [vmem:[#allocation15_spill] sm:$0xff] }
  0x41   : > { %10127 = vst [vmem:[#allocation47_spill] sm:$0xff] %v8714_v44  ;;  %v8725_v63 = vpack.c.bf16 %v1100_v23, %v1093_v57  ;;  %v1107_v0 = vand.u32 4294901760, %v8315_v38  ;;  %v1114_v27 = vand.u32 4294901760, %v8341_v47  ;;  %v995_v13 = vand.u32 4294901760, %v8356_v51  ;;  %7310 = vmatpush3.bf16.msra.mxu1 %v8714_v44  ;;  %729 = vmatmul.mubr.f32.vlgmr.msra.gmra.mrb[0].mxu0 %v8228_v5  ;;  %v10143_v44 = vld [vmem:[#allocation21_spill] sm:$0xff] }
  0x42   : > { %v8722_v22 = vpack.c.bf16 %v10129_v58, %v10128_v53  ;;  %v1002_v2 = vand.u32 4294901760, %v8361_v52  ;;  %v1121_v15 = vand.u32 4294901760, %v8392_v1  ;;  %v10131_v16 = vand.u32 4294901760, %v8431_v62  ;;  %801 = vmatprep.mubr.f32.mxu0 %v10089_v10  ;;  %v10162_v10 = vld [vmem:[#allocation24_spill] sm:$0xff] }
  0x43   : > { %10130 = vst [vmem:[#allocation48_spill] sm:$0xff] %v8725_v63  ;;  %v10132_v31 = vand.u32 4294901760, %v8434_v61  ;;  %v8745_v43 = vpack.c.bf16 %v988_v49, %v981_v48  ;;  %v10136_v21 = vand.u32 4294901760, %v10135_v19  ;;  %v10138_v25 = vand.u32 4294901760, %v10137_v28  ;;  %7344 = vmatprep.subr.bf16.mxu1 %v8725_v63  ;;  %v10140_v61 = vld [vmem:[#allocation7_spill] sm:$0xff] }
  0x44   : > { %738 = vmatpush1.msra.mxu0 %v10140_v61  ;;  %v8757_v62 = vpack.c.bf16 %v1114_v27, %v1107_v0  ;;  %v10145_v53 = vand.u32 4294901760, %v10144_v45  ;;  %v10147_v58 = vand.u32 4294901760, %v10146_v6  ;;  %v8769_v28 = vpack.c.bf16 %v1002_v2, %v995_v13  ;;  %1343 = vmatmul.mubr.f32.vlgmr.msra.gmra.mrb[0].mxu1 %v8628_v46 }
  0x45   : > { %v8741_v32 = vpack.c.bf16 %v10132_v31, %v10131_v16  ;;  %10134 = vst [vmem:[#allocation50_spill] sm:$0xff] %v8745_v43  ;;  %v8753_v9 = vpack.c.bf16 %v10138_v25, %v10136_v21  ;;  %v10142_v16 = vld [vmem:[#allocation17_spill] sm:$0xff]  ;;  %7216 = vmatprep.subr.bf16.mxu0 %v8665_v59  ;;  %v10150_v19 = vand.u32 4294901760, %v8397_v3  ;;  %v10152_v25 = vand.u32 4294901760, %v8406_v11  ;;  %7346 = vmatpush3.bf16.msra.mxu1 %v8745_v43  ;;  %v10168_v43 = vld [vmem:[#allocation30_spill] sm:$0xff] }
  0x46   : > { %10141 = vst [vmem:[#allocation15_spill] sm:$0xff] %v8757_v62  ;;  %10149 = vst [vmem:[#allocation17_spill] sm:$0xff] %v8769_v28  ;;  %v10153_v45 = vand.u32 4294901760, %v8411_v12  ;;  %v10155_v6 = vand.u32 4294901760, %v8426_v50  ;;  %v1094_v7 = vsub.f32 %v8283_v29, %v1093_v57  ;;  %v1101_v31 = vsub.f32 %v8298_v33, %v1100_v23  ;;  %7348 = vmatprep.subr.bf16.mxu1 %v8757_v62 }
  0x47   : > { %10133 = vst [vmem:[#allocation49_spill] sm:$0xff] %v8741_v32  ;;  %10139 = vst [vmem:[#allocation14_spill] sm:$0xff] %v8753_v9  ;;  %v8765_v32 = vpack.c.bf16 %v10147_v58, %v10145_v53  ;;  %v8773_v21 = vpack.c.bf16 %v10150_v19, %v1121_v15  ;;  %v10156_v53 = vand.u32 4294901760, %v8444_v8  ;;  %v10158_v19 = vand.u32 4294901760, %v8456_v41  ;;  %v10163_v9 = vld [vmem:[#allocation27_spill] sm:$0xff] }
  0x48   : > { %v8780_v61 = vpack.c.bf16 %v10153_v45, %v10152_v25  ;;  %v10159_v63 = vand.u32 4294901760, %v8461_v18  ;;  %v10161_v25 = vld [vmem:[#allocation23_spill] sm:$0xff]  ;;  %v10165_v23 = vand.u32 4294901760, %v10142_v16  ;;  %v10166_v29 = vand.u32 4294901760, %v10143_v44 }
  0x49   : > { %10148 = vst [vmem:[#allocation7_spill] sm:$0xff] %v8765_v32  ;;  %10151 = vst [vmem:[#allocation21_spill] sm:$0xff] %v8773_v21  ;;  %v8786_v58 = vpack.c.bf16 %v10156_v53, %v10155_v6  ;;  %v10164_v6 = vld [vmem:[#allocation5_spill] sm:$0xff]  ;;  %v1095_v57 = vand.u32 4294901760, %v1094_v7  ;;  %v1102_v53 = vand.u32 4294901760, %v1101_v31  ;;  %v989_v32 = vsub.f32 %v8308_v35, %v988_v49  ;;  %7350 = vmatpush3.bf16.msra.mxu1 %v8769_v28 }
  0x4a   : > { %10154 = vst [vmem:[#allocation18_spill] sm:$0xff] %v8780_v61  ;;  %v8795_v59 = vpack.c.bf16 %v10159_v63, %v10158_v19  ;;  %1617 = vmatprep.mubr.f32.mxu1 %v10164_v6  ;;  %v8806_v33 = vpack.c.bf16 %v10166_v29, %v10165_v23  ;;  %v982_v63 = vsub.f32 %v8303_v34, %v981_v48  ;;  %v966_v19 = vand.u32 4294901760, %v8659_v36 }
  0x4b   : > { %10157 = vst [vmem:[#allocation19_spill] sm:$0xff] %v8786_v58  ;;  %v1108_v46 = vsub.f32 %v8315_v38, %v1107_v0  ;;  %v1115_v45 = vsub.f32 %v8341_v47, %v1114_v27  ;;  %v1170_v62 = vand.u32 4294901760, %v10168_v43  ;;  %v1051_v6 = vand.u32 4294901760, %v8549_v55  ;;  %803 = vmatmul.mubr.f32.vlgmr.msra.gmra.mrb[0].mxu0 %v8228_v5  ;;  %7352 = vmatprep.subr.bf16.mxu1 %v8773_v21 }
  0x4c   : > { %10160 = vst [vmem:[#allocation51_spill] sm:$0xff] %v8795_v59  ;;  %10167 = vst [vmem:[#allocation23_spill] sm:$0xff] %v8806_v33  ;;  %v8815_v54 = vpack.c.bf16 %v1102_v53, %v1095_v57  ;;  %v983_v23 = vand.u32 4294901760, %v982_v63  ;;  %v10170_v34 = vand.u32 4294901760, %v10161_v25  ;;  %v10171_v36 = vand.u32 4294901760, %v10162_v10  ;;  %7218 = vmatpush3.bf16.msra.mxu0 %v8671_v40  ;;  %967 = vmatprep.mubr.f32.mxu0 %v966_v19 }
  0x4d   : > { %v990_v38 = vand.u32 4294901760, %v989_v32  ;;  %v1109_v7 = vand.u32 4294901760, %v1108_v46  ;;  %v1116_v47 = vand.u32 4294901760, %v1115_v45  ;;  %v1058_v48 = vand.u32 4294901760, %v8554_v4  ;;  %7220 = vmatprep.subr.bf16.mxu0 %v8677_v42  ;;  %7354 = vmatpush3.bf16.msra.mxu1 %v8780_v61 }
  0x4e   : > { %10169 = vst [vmem:[#allocation24_spill] sm:$0xff] %v8815_v54  ;;  %v8823_v35 = vpack.c.bf16 %v10171_v36, %v10170_v34  ;;  %v996_v49 = vsub.f32 %v8356_v51, %v995_v13  ;;  %v1003_v0 = vsub.f32 %v8361_v52, %v1002_v2  ;;  %v1122_v5 = vsub.f32 %v8392_v1, %v1121_v15 }
  0x4f   : > { %v1177_v27 = vand.u32 4294901760, %v8572_v37  ;;  %v1184_v32 = vand.u32 4294901760, %v8586_v60  ;;  %v8834_v46 = vpack.c.bf16 %v990_v38, %v983_v23  ;;  %v8836_v31 = vpack.c.bf16 %v1116_v47, %v1109_v7  ;;  %7356 = vmatprep.subr.bf16.mxu1 %v8786_v58 }
  0x50   : > { %10172 = vst [vmem:[#allocation27_spill] sm:$0xff] %v8823_v35  ;;  %v997_v45 = vand.u32 4294901760, %v996_v49  ;;  %v1004_v29 = vand.u32 4294901760, %v1003_v0  ;;  %v1123_v57 = vand.u32 4294901760, %v1122_v5  ;;  %v10175_v51 = vand.u32 4294901760, %v8397_v3  ;;  %7222 = vmatpush3.bf16.msra.mxu0 %v8685_v14 }
  0x51   : > { %10173 = vst [vmem:[#allocation30_spill] sm:$0xff] %v8834_v46  ;;  %10174 = vst [vmem:[#allocation52_spill] sm:$0xff] %v8836_v31  ;;  %v10176_v1 = vand.u32 4294901760, %v10163_v9  ;;  %v10178_v2 = vand.u32 4294901760, %v8406_v11  ;;  %v10179_v53 = vand.u32 4294901760, %v8411_v12  ;;  %v10180_v19 = vand.u32 4294901760, %v8426_v50  ;;  %7224 = vmatprep.subr.bf16.mxu0 %v8691_v20  ;;  %7358 = vmatpush3.bf16.msra.mxu1 %v8795_v59 }
  0x52   : > { %v1129_v52 = vsub.f32 %v8397_v3, %v10175_v51  ;;  %v1065_v23 = vand.u32 4294901760, %v8602_v39  ;;  %v8860_v34 = vpack.c.bf16 %v1004_v29, %v997_v45  ;;  %v10182_v38 = vand.u32 4294901760, %v8444_v8  ;;  %7360 = vmatprep.subr.bf16.mxu1 %v8806_v33  ;;  %v852_v59 = vld [vmem:[%s8243_s13 + $0x158] sm:$0xff] }
  0x53   : > { %v8846_v13 = vpack.c.bf16 %v1170_v62, %v10176_v1  ;;  %v1010_v15 = vsub.f32 %v8406_v11, %v10178_v2  ;;  %v1017_v63 = vsub.f32 %v8411_v12, %v10179_v53  ;;  %v1136_v3 = vsub.f32 %v8426_v50, %v10180_v19 }
  0x54   : > { %10181 = vst [vmem:[#allocation54_spill] sm:$0xff] %v8860_v34  ;;  %v1130_v36 = vand.u32 4294901760, %v1129_v52  ;;  %v1143_v11 = vsub.f32 %v8444_v8, %v10182_v38  ;;  %v1072_v12 = vand.u32 4294901760, %v8607_v17  ;;  %v10184_v5 = vand.u32 4294901760, %v8456_v41  ;;  %v10186_v8 = vld [vmem:[#allocation40_spill] sm:$0xff]  ;;  %7226 = vmatpush3.bf16.msra.mxu0 %v8697_v26 }
  0x55   : > { %10177 = vst [vmem:[#allocation53_spill] sm:$0xff] %v8846_v13  ;;  %v1011_v7 = vand.u32 4294901760, %v1010_v15  ;;  %v1018_v47 = vand.u32 4294901760, %v1017_v63  ;;  %v1137_v50 = vand.u32 4294901760, %v1136_v3  ;;  %v10185_v29 = vand.u32 4294901760, %v8461_v18  ;;  %7228 = vmatprep.subr.bf16.mxu0 %v8703_v30  ;;  %7362 = vmatpush3.bf16.msra.mxu1 %v8823_v35  ;;  %v850_v35 = vld [vmem:[%s8243_s13 + $0x148] sm:$0xff] }
  0x56   : > { %v8867_v49 = vpack.c.bf16 %v1130_v36, %v1123_v57  ;;  %v1144_v0 = vand.u32 4294901760, %v1143_v11  ;;  %v1024_v45 = vsub.f32 %v8456_v41, %v10184_v5  ;;  %v1191_v52 = vand.u32 4294901760, %v10186_v8  ;;  %7364 = vmatprep.subr.bf16.mxu1 %v8846_v13  ;;  %v849_v13 = vld [vmem:[%s8243_s13 + $0x140] sm:$0xff] }
  0x57   : > { %v1031_v51 = vsub.f32 %v8461_v18, %v10185_v29  ;;  %v8877_v1 = vpack.c.bf16 %v1018_v47, %v1011_v7  ;;  %v10188_v2 = vand.u32 4294901760, %v10142_v16  ;;  %v10189_v15 = vand.u32 4294901760, %v10143_v44 }
  0x58   : > { %10183 = vst [vmem:[#allocation55_spill] sm:$0xff] %v8867_v49  ;;  %v8891_v41 = vpack.c.bf16 %v1058_v48, %v1051_v6  ;;  %v8893_v18 = vpack.c.bf16 %v1144_v0, %v1137_v50  ;;  %v1025_v63 = vand.u32 4294901760, %v1024_v45  ;;  %v10193_v38 = vand.u32 4294901760, %v10161_v25  ;;  %7230 = vmatpush3.bf16.msra.mxu0 %v8709_v24 }
  0x59   : > { %10187 = vst [vmem:[#allocation40_spill] sm:$0xff] %v8877_v1  ;;  %v1150_v57 = vsub.f32 %v10142_v16, %v10188_v2  ;;  %v1157_v53 = vsub.f32 %v10143_v44, %v10189_v15  ;;  %v1032_v19 = vand.u32 4294901760, %v1031_v51  ;;  %v10192_v16 = vld [vmem:[#allocation41_spill] sm:$0xff]  ;;  %v10195_v47 = vand.u32 4294901760, %v10162_v10  ;;  %7232 = vmatprep.subr.bf16.mxu0 %v8722_v22 }
  0x5a   : > { %10190 = vst [vmem:[#allocation56_spill] sm:$0xff] %v8891_v41  ;;  %10191 = vst [vmem:[#allocation57_spill] sm:$0xff] %v8893_v18  ;;  %v1198_v3 = vand.u32 4294901760, %v10192_v16  ;;  %v1038_v11 = vsub.f32 %v10161_v25, %v10193_v38  ;;  %v10196_v50 = vand.u32 4294901760, %v10163_v9  ;;  %v1171_v45 = vsub.f32 %v10168_v43, %v1170_v62  ;;  %7366 = vmatpush3.bf16.msra.mxu1 %v8891_v41 }
  0x5b   : > { %v1151_v36 = vand.u32 4294901760, %v1150_v57  ;;  %v1158_v44 = vand.u32 4294901760, %v1157_v53  ;;  %v8900_v7 = vpack.c.bf16 %v1032_v19, %v1025_v63  ;;  %v1045_v5 = vsub.f32 %v10162_v10, %v10195_v47  ;;  %v10202_v47 = vld [vmem:[#allocation42_spill] sm:$0xff] }
  0x5c   : > { %v1164_v0 = vsub.f32 %v10163_v9, %v10196_v50  ;;  %v8916_v25 = vpack.c.bf16 %v1184_v32, %v1177_v27  ;;  %v1079_v29 = vand.u32 4294901760, %v8640_v56  ;;  %v1039_v10 = vand.u32 4294901760, %v1038_v11 }
  0x5d   : > { %10194 = vst [vmem:[#allocation41_spill] sm:$0xff] %v8900_v7  ;;  %v8919_v51 = vpack.c.bf16 %v1158_v44, %v1151_v36  ;;  %v8925_v9 = vpack.c.bf16 %v1072_v12, %v1065_v23  ;;  %v1046_v43 = vand.u32 4294901760, %v1045_v5  ;;  %v1172_v2 = vand.u32 4294901760, %v1171_v45  ;;  %v10200_v36 = vld [vmem:[#allocation44_spill] sm:$0xff]  ;;  %v10204_v45 = vld [vmem:[#allocation22_spill] sm:$0xff] }
  0x5e   : > { %10197 = vst [vmem:[#allocation58_spill] sm:$0xff] %v8916_v25  ;;  %v1165_v62 = vand.u32 4294901760, %v1164_v0  ;;  %v1052_v57 = vsub.f32 %v8549_v55, %v1051_v6  ;;  %v1059_v15 = vsub.f32 %v8554_v4, %v1058_v48  ;;  %v1178_v53 = vsub.f32 %v8572_v37, %v1177_v27  ;;  %v10203_v27 = vld [vmem:[#allocation49_spill] sm:$0xff]  ;;  %7368 = vmatprep.subr.bf16.mxu1 %v8916_v25 }
  0x5f   : > { %10198 = vst [vmem:[#allocation59_spill] sm:$0xff] %v8925_v9  ;;  %v1185_v63 = vsub.f32 %v8586_v60, %v1184_v32  ;;  %v8940_v19 = vpack.c.bf16 %v1198_v3, %v1191_v52  ;;  %v1086_v44 = vand.u32 4294901760, %v10200_v36  ;;  %v8943_v38 = vpack.c.bf16 %v1046_v43, %v1039_v10  ;;  %7234 = vmatpush3.bf16.msra.mxu0 %v10203_v27  ;;  %v8952_v60 = vld [vmem:[%s8243_s13 + $0x100] sm:$0xff]  ;;  %v8955_v32 = vld [vmem:[%s8243_s13 + $0x108] sm:$0xff] }
  0x60   : > { %v8945_v55 = vpack.c.bf16 %v1172_v2, %v1165_v62  ;;  %v1053_v4 = vand.u32 4294901760, %v1052_v57  ;;  %v1060_v6 = vand.u32 4294901760, %v1059_v15  ;;  %v1179_v48 = vand.u32 4294901760, %v1178_v53  ;;  %v10206_v43 = vld [vmem:[#allocation25_spill] sm:$0xff]  ;;  %v10208_v57 = vld [vmem:[#allocation14_spill] sm:$0xff]  ;;  %7370 = vmatpush3.bf16.msra.mxu1 %v8925_v9 }
  0x61   : > { %10199 = vst [vmem:[#allocation60_spill] sm:$0xff] %v8940_v19  ;;  %10201 = vst [vmem:[#allocation44_spill] sm:$0xff] %v8943_v38  ;;  %v1186_v11 = vand.u32 4294901760, %v1185_v63  ;;  %v1066_v5 = vsub.f32 %v8602_v39, %v1065_v23  ;;  %v1073_v50 = vsub.f32 %v8607_v17, %v1072_v12  ;;  %v1192_v0 = vsub.f32 %v10186_v8, %v1191_v52  ;;  %v10209_v23 = vld [vmem:[#allocation28_spill] sm:$0xff]  ;;  %v10211_v12 = vld [vmem:[#allocation29_spill] sm:$0xff] }
  0x62   : > { %v10205_v10 = vand.u32 4294901760, %v10204_v45  ;;  %v10207_v62 = vand.u32 4294901760, %v10206_v43  ;;  %7236 = vmatprep.subr.bf16.mxu0 %v10208_v57  ;;  %v8969_v15 = vpack.c.bf16 %v1060_v6, %v1053_v4  ;;  %v1199_v39 = vsub.f32 %v10192_v16, %v1198_v3  ;;  %v8988_v16 = vld [vmem:[%s9902_s6] sm:$0xff]  ;;  %v10215_v3 = vld [vmem:[#allocation7_spill] sm:$0xff]  ;;  %7372 = vmatprep.subr.bf16.mxu1 %v8940_v19 }
  0x63   : > { %v8971_v53 = vpack.c.bf16 %v1186_v11, %v1179_v48  ;;  %v10210_v17 = vand.u32 4294901760, %v10209_v23  ;;  %v10212_v8 = vand.u32 4294901760, %v10211_v12  ;;  %v1067_v63 = vand.u32 4294901760, %v1066_v5  ;;  %7238 = vmatpush3.bf16.msra.mxu0 %v10215_v3  ;;  %v8993_v11 = vld [vmem:[%s8243_s13 + $0x110] sm:$0xff]  ;;  %v8996_v5 = vld [vmem:[%s8243_s13 + $0x118] sm:$0xff] }
  0x64   : > { %v8966_v2 = vpack.c.bf16 %v10207_v62, %v10205_v10  ;;  %v1074_v45 = vand.u32 4294901760, %v1073_v50  ;;  %v1193_v10 = vand.u32 4294901760, %v1192_v0  ;;  %v8981_v43 = vpack.c.bf16 %v1086_v44, %v1079_v29 }
  0x65   : > { %v8978_v52 = vpack.c.bf16 %v10212_v8, %v10210_v17  ;;  %v9997_v4 = vand.u32 4294901760, %v8952_v60  ;;  %v1200_v48 = vand.u32 4294901760, %v1199_v39  ;;  %v1080_v0 = vsub.f32 %v8640_v56, %v1079_v29  ;;  %v10216_v39 = vld [vmem:[#allocation31_spill] sm:$0xff]  ;;  %v10218_v17 = vld [vmem:[#allocation33_spill] sm:$0xff] }
  0x66   : > { %10214 = vst [vmem:[#allocation22_spill] sm:$0xff] %v8981_v43  ;;  %v8998_v50 = vpack.c.bf16 %v1074_v45, %v1067_v63  ;;  %v1087_v62 = vsub.f32 %v10200_v36, %v1086_v44  ;;  %v10217_v23 = vand.u32 4294901760, %v10216_v39  ;;  %v10219_v12 = vand.u32 4294901760, %v10218_v17  ;;  %7240 = vmatprep.subr.bf16.mxu0 %v8966_v2  ;;  %7374 = vmatpush3.bf16.msra.mxu1 %v8981_v43  ;;  %v10226_v39 = vld [vmem:[#allocation36_spill] sm:$0xff] }
  0x67   : > { %10213 = vst [vmem:[#allocation49_spill] sm:$0xff] %v8978_v52  ;;  %v9009_v37 = vpack.c.bf16 %v1200_v48, %v1193_v10  ;;  %v9995_v6 = vmov 1   ;;  %v1081_v63 = vand.u32 4294901760, %v1080_v0  ;;  %v10221_v56 = vand.u32 4294901760, %v8955_v32  ;;  %v10224_v0 = vld [vmem:[#allocation35_spill] sm:$0xff]  ;;  %7242 = vmatpush3.bf16.msra.mxu0 %v8978_v52 }
  0x68   : > { %v9006_v8 = vpack.c.bf16 %v10219_v12, %v10217_v23  ;;  %8015 = vset.pattern.permute.xlu0 %v9995_v6  ;;  %v1088_v45 = vand.u32 4294901760, %v1087_v62  ;;  %8017 = vset.pattern.permute.xlu1 %v9995_v6  ;;  %v1735_v36 = vand.u32 4294901760, %v8993_v11  ;;  %v1738_v44 = vand.u32 4294901760, %v8996_v5  ;;  %v846_v6 = vld [vmem:[%s8243_s13 + $0x128] sm:$0xff] }
  0x69   : > { %2373 = vperm.xlu0 %8015, %v8988_v16   ;;  %v9019_v29 = vpack.c.bf16 %v10221_v56, %v9997_v4  ;;  %v10223_v10 = vand.u32 4294901760, %v10202_v47  ;;  %v10225_v62 = vand.u32 4294901760, %v10224_v0  ;;  %v10227_v23 = vand.u32 4294901760, %v10226_v39  ;;  %v845_v56 = vld [vmem:[%s8243_s13 + $0x120] sm:$0xff]  ;;  %v10229_v0 = vld [vmem:[#allocation38_spill] sm:$0xff]  ;;  %v848_v39 = vld [vmem:[%s8243_s13 + $0x138] sm:$0xff] }
  0x6a   : > { %10220 = vst [vmem:[#allocation25_spill] sm:$0xff] %v9006_v8  ;;  %v9998_v12 = vmov 0.0|0.0   ;;  %v9036_v4 = vpack.c.bf16 %v1088_v45, %v1081_v63  ;;  %7244 = vmatprep.subr.bf16.mxu0 %v9006_v8  ;;  %1619 = vmatmul.mubr.f32.vlgmr.msra.gmra.mrb[2].mxu1 %v10229_v0  ;;  %v1741_v63 = vand.u32 4294901760, %v845_v56  ;;  %v1744_v45 = vand.u32 4294901760, %v846_v6 }
  0x6b   : > { %10222 = vst [vmem:[#allocation14_spill] sm:$0xff] %v9019_v29  ;;  %v971_v48 = vsub.f32 %v10202_v47, %v10223_v10  ;;  %v9030_v17 = vpack.c.bf16 %v10227_v23, %v10225_v62  ;;  %7407 = vmatprep.subr.bf16.mxu1 %v9998_v12  ;;  %v859_v10 = vld [vmem:[%s9900_s4 + $0x10] sm:$0xff]  ;;  %v9046_v23 = vpack.c.bf16 %v1738_v44, %v1735_v36  ;;  %v10231_v43 = vmov 0.0  }
  0x6c   : > { %v847_v62 = vld [vmem:[%s8243_s13 + $0x130] sm:$0xff]  ;;  %7409 = vmatpush3.bf16.msra.mxu1 %v9019_v29  ;;  %6707 = vmatprep.mubr.msk.f32.mxu1 %vm8112_vm2, %v10231_v43  ;;  %v10232_v19 = vmov 0.0|0.0   ;;  %v9052_v9 = vand.u32 4294901760, %v859_v10  ;;  %v1750_v41 = vand.u32 4294901760, %v848_v39  ;;  %v9061_v33 = vpack.c.bf16 %v1744_v45, %v1741_v63  ;;  %v9075_v29 = vld [vmem:[%s8243_s13 + $0x160] sm:$0xff] }
  0x6d   : > { %10228 = vst [vmem:[#allocation28_spill] sm:$0xff] %v9030_v17  ;;  %10230 = vst [vmem:[#allocation29_spill] sm:$0xff] %v9046_v23  ;;  %v972_v12 = vand.u32 4294901760, %v971_v48  ;;  %7246 = vmatpush3.bf16.msra.mxu0 %v9030_v17  ;;  %7410 = vmatprep.subr.bf16.mxu1 %v10232_v19  ;;  %v1747_v25 = vand.u32 4294901760, %v847_v62  ;;  %v9058_v48 = vld [vmem:[%s8243_s13 + $0x150] sm:$0xff]  ;;  %v1753_v21 = vand.u32 4294901760, %v849_v13  ;;  %v9088_v17 = vsub.f32 %v8993_v11, %v1735_v36 }
  0x6e   : > { %10233 = vst [vmem:[#allocation7_spill] sm:$0xff] %v9052_v9  ;;  %7248 = vmatprep.subr.bf16.mxu0 %v8815_v54  ;;  %v9067_v58 = vsub.f32 %v859_v10, %v9052_v9  ;;  %v1756_v28 = vand.u32 4294901760, %v850_v35  ;;  %v1759_v54 = vand.u32 4294901760, %v9058_v48  ;;  %v10236_v10 = vand.u32 4294901760, %v8955_v32  ;;  %v854_v9 = vld [vmem:[%s8243_s13 + $0x168] sm:$0xff] }
  0x6f   : > { %v9070_v61 = vpack.c.bf16 %v1750_v41, %v1747_v25  ;;  %v9095_v8 = vsub.f32 %v845_v56, %v1741_v63  ;;  %v9097_v52 = vsub.f32 %v846_v6, %v1744_v45  ;;  %v1765_v36 = vand.u32 4294901760, %v9075_v29  ;;  %v855_v45 = vld [vmem:[%s8243_s13 + $0x170] sm:$0xff] }
  0x70   : > { %7412 = vmatpush3.bf16.msra.mxu1 %v9046_v23  ;;  %973 = vmatmul.mubr.f32.vlgmr.msra.gmra.mrb[2].mxu0 %v972_v12  ;;  %v10234_v12 = vld [vmem:[#allocation5_spill] sm:$0xff]  ;;  %v1762_v23 = vand.u32 4294901760, %v852_v59  ;;  %v9107_v11 = vsub.f32 %v850_v35, %v1756_v28  ;;  %v9114_v6 = vsub.f32 %v9058_v48, %v1759_v54  ;;  %v1836_v35 = vand.u32 4294901760, %v9088_v17  ;;  %v856_v48 = vld [vmem:[%s8243_s13 + $0x178] sm:$0xff]  ;;  %s8116_s13 = smov 4  }
  0x71   : > { %7250 = vmatpush3.bf16.msra.mxu0 %v8834_v46  ;;  %7413 = vmatprep.subr.bf16.mxu1 %v10232_v19  ;;  %v10235_v46 = vand.u32 4294901760, %v8952_v60  ;;  %v1857_v56 = vand.u32 4294901760, %v9097_v52 }
  0x72   : > { %7252 = vmatprep.subr.bf16.mxu0 %v8836_v31  ;;  %1203 = vmatprep.mubr.f32.mxu0 %v10234_v12  ;;  %v9085_v31 = vsub.f32 %v8955_v32, %v10236_v10  ;;  %v9093_v12 = vsub.f32 %v8996_v5, %v1738_v44  ;;  %v9105_v32 = vsub.f32 %v849_v13, %v1753_v21  ;;  %v1768_v44 = vand.u32 4294901760, %v854_v9 }
  0x73   : > { %v9080_v47 = vsub.f32 %v8952_v60, %v10235_v46  ;;  %v9099_v46 = vsub.f32 %v847_v62, %v1747_v25  ;;  %v9103_v60 = vsub.f32 %v848_v39, %v1750_v41  ;;  %v9110_v5 = vpack.c.bf16 %v1756_v28, %v1753_v21 }
  0x74   : > { %7415 = vmatpush3.bf16.msra.mxu1 %v9061_v33  ;;  %v9116_v25 = vsub.f32 %v852_v59, %v1762_v23  ;;  %v1829_v13 = vand.u32 4294901760, %v9085_v31  ;;  %v1843_v28 = vand.u32 4294901760, %v9093_v12  ;;  %v1850_v21 = vand.u32 4294901760, %v9095_v8 }
  0x75   : > { %7254 = vmatpush3.bf16.msra.mxu0 %v8860_v34  ;;  %7416 = vmatprep.subr.bf16.mxu1 %v10232_v19  ;;  %v1822_v41 = vand.u32 4294901760, %v9080_v47  ;;  %v10033_v34 = vmov 0   ;;  %v9142_v62 = vsub.f32 %v9075_v29, %v1765_v36  ;;  %v9144_v39 = vsub.f32 %v854_v9, %v1768_v44 }
  0x76   : > { %7256 = vmatprep.subr.bf16.mxu0 %v8867_v49  ;;  %8016 = vset.pattern.permute.xlu0 %v10033_v34  ;;  %v9147_v63 = vpack.c.bf16 %v1857_v56, %v1850_v21  ;;  %v10240_v10 = vand.u32 4294901760, %v9099_v46  ;;  %v10241_v49 = vand.u32 4294901760, %v9103_v60  ;;  %v9156_v34 = vpack.c.bf16 %v1762_v23, %v1759_v54 }
  0x77   : > { %v9137_v59 = vpack.c.bf16 %v1829_v13, %v1822_v41  ;;  %863 = vperm.xlu0 %8016, %v8988_v16   ;;  %v10244_v29 = vand.u32 4294901760, %v9107_v11  ;;  %v1771_v16 = vand.u32 4294901760, %v855_v45  ;;  %v10043_v54 = vand.u32 4294901760, %v9067_v58 }
  0x78   : > { %7418 = vmatpush3.bf16.msra.mxu1 %v9070_v61  ;;  %10239 = vst [vmem:[#allocation35_spill] sm:$0xff] %v9147_v63  ;;  %v1774_v63 = vand.u32 4294901760, %v856_v48  ;;  %v10045_v23 = vand.u32 4294901760, %v9142_v62 }
  0x79   : > { %7258 = vmatpush3.bf16.msra.mxu0 %v8877_v1  ;;  %7419 = vmatprep.subr.bf16.mxu1 %v10232_v19  ;;  %10237 = vst [vmem:[#allocation31_spill] sm:$0xff] %v9137_v59  ;;  %v9139_v1 = vpack.c.bf16 %v1843_v28, %v1836_v35  ;;  %v10246_v59 = vand.u32 4294901760, %v9114_v6 }
  0x7a   : > { %7260 = vmatprep.subr.bf16.mxu0 %v8893_v18  ;;  %v9153_v18 = vpack.c.bf16 %v10241_v49, %v10240_v10  ;;  %v10247_v49 = vand.u32 4294901760, %v9116_v25 }
  0x7b   : > { %10238 = vst [vmem:[#allocation33_spill] sm:$0xff] %v9139_v1  ;;  %v10243_v1 = vand.u32 4294901760, %v9105_v32 }
  0x7c   : > { %10242 = vst [vmem:[#allocation36_spill] sm:$0xff] %v9153_v18  ;;  %7421 = vmatpush3.bf16.msra.mxu1 %v9110_v5  ;;  %v9170_v10 = vpack.c.bf16 %v10247_v49, %v10246_v59  ;;  %v1823_v18 = vsub.f32 %v9080_v47, %v1822_v41  ;;  %v1830_v59 = vsub.f32 %v9085_v31, %v1829_v13 }
  0x7d   : > { %v9162_v9 = vpack.c.bf16 %v10244_v29, %v10243_v1  ;;  %7262 = vmatpush3.bf16.msra.mxu0 %v8900_v7  ;;  %7422 = vmatprep.subr.bf16.mxu1 %v10232_v19  ;;  %v10042_v1 = vand.u32 4294901760, %v9144_v39  ;;  %v9176_v29 = vsub.f32 %v855_v45, %v1771_v16  ;;  %v9178_v7 = vsub.f32 %v856_v48, %v1774_v63 }
  0x7e   : > { %7264 = vmatprep.subr.bf16.mxu0 %v8919_v51  ;;  %v9194_v48 = vpack.c.bf16 %v1774_v63, %v1771_v16  ;;  %v1824_v13 = vand.u32 4294901760, %v1823_v18  ;;  %v1831_v49 = vand.u32 4294901760, %v1830_v59 }
  0x7f   : > { %10245 = vst [vmem:[#allocation38_spill] sm:$0xff] %v9162_v9  ;;  %v9181_v9 = vpack.c.bf16 %v1768_v44, %v1765_v36  ;;  %v9191_v45 = vpack.c.bf16 %v10042_v1, %v10045_v23  ;;  %v1812_v36 = vsub.f32 %v9067_v58, %v10043_v54  ;;  %v1920_v44 = vand.u32 4294901760, %v9176_v29 }
  0x80   : > { %7424 = vmatpush3.bf16.msra.mxu1 %v9156_v34  ;;  %v10044_v41 = vand.u32 4294901760, %v9178_v7  ;;  %v1844_v1 = vsub.f32 %v9093_v12, %v1843_v28  ;;  %v1851_v54 = vsub.f32 %v9095_v8, %v1850_v21  ;;  %v9213_v18 = vpack.c.bf16 %v1831_v49, %v1824_v13  ;;  %v10252_v49 = vld [vmem:[#allocation46_spill] sm:$0xff] }
  0x81   : > { %7266 = vmatpush3.bf16.msra.mxu0 %v8943_v38  ;;  %7425 = vmatprep.subr.bf16.mxu1 %v10232_v19  ;;  %v1837_v38 = vsub.f32 %v9088_v17, %v1836_v35  ;;  %v1813_v16 = vand.u32 4294901760, %v1812_v36  ;;  %v1858_v28 = vsub.f32 %v9097_v52, %v1857_v56 }
  0x82   : > { %7268 = vmatprep.subr.bf16.mxu0 %v8945_v55  ;;  %v9208_v63 = vpack.c.bf16 %v10044_v41, %v1920_v44  ;;  %10248 = vst [vmem:[#allocation61_spill] sm:$0xff] %v9213_v18  ;;  %v1845_v59 = vand.u32 4294901760, %v1844_v1  ;;  %v10249_v41 = vand.u32 4294901760, %v9099_v46  ;;  %v1852_v13 = vand.u32 4294901760, %v1851_v54 }
  0x83   : > { %v1838_v35 = vand.u32 4294901760, %v1837_v38  ;;  %v1859_v38 = vand.u32 4294901760, %v1858_v28  ;;  %v10251_v1 = vand.u32 4294901760, %v9103_v60  ;;  %v10254_v28 = vand.u32 4294901760, %v9107_v11 }
  0x84   : > { %7427 = vmatpush3.bf16.msra.mxu1 %v9181_v9  ;;  %v1865_v36 = vsub.f32 %v9099_v46, %v10249_v41 }
  0x85   : > { %7270 = vmatpush3.bf16.msra.mxu0 %v8969_v15  ;;  %7428 = vmatprep.subr.bf16.mxu1 %v10232_v19  ;;  %v9223_v21 = vpack.c.bf16 %v1845_v59, %v1838_v35  ;;  %v1872_v56 = vsub.f32 %v9103_v60, %v10251_v1  ;;  %v9235_v54 = vpack.c.bf16 %v1859_v38, %v1852_v13  ;;  %v10253_v35 = vand.u32 4294901760, %v9105_v32 }
  0x86   : > { %7272 = vmatprep.subr.bf16.mxu0 %v8971_v53  ;;  %v1866_v41 = vand.u32 4294901760, %v1865_v36  ;;  %v1886_v1 = vsub.f32 %v9107_v11, %v10254_v28  ;;  %v10255_v36 = vld [vmem:[#allocation6_spill] sm:$0xff]  ;;  %v10257_v13 = vand.u32 4294901760, %v9114_v6  ;;  %v10258_v28 = vand.u32 4294901760, %v9116_v25 }
  0x87   : > { %10250 = vst [vmem:[#allocation62_spill] sm:$0xff] %v9223_v21  ;;  %v1879_v59 = vsub.f32 %v9105_v32, %v10253_v35  ;;  %v10256_v23 = vand.u32 4294901760, %v10255_v36 }
  0x88   : > { %7430 = vmatpush3.bf16.msra.mxu1 %v9194_v48  ;;  %v1893_v38 = vsub.f32 %v9114_v6, %v10257_v13 }
  0x89   : > { %7274 = vmatpush3.bf16.msra.mxu0 %v8998_v50  ;;  %7431 = vmatprep.subr.bf16.mxu1 %v10232_v19  ;;  %v1880_v35 = vand.u32 4294901760, %v1879_v59  ;;  %v10261_v59 = vand.u32 4294901760, %v9144_v39 }
  0x8a   : > { %7276 = vmatprep.subr.bf16.mxu0 %v9009_v37 }
  0x8b   : > { %6708 = vmatmul.mubr.f32.vlgmr.msra.gmra.mrb[4].mxu1 %v1813_v16  ;;  %v1873_v16 = vand.u32 4294901760, %v1872_v56 }
  0x8c   : > { %7433 = vmatpush3.bf16.msra.mxu1 %v9213_v18  ;;  %6742 = vmatprep.mubr.msk.f32.mxu1 %vm8112_vm2, %v10231_v43  ;;  %v1900_v18 = vsub.f32 %v9116_v25, %v10258_v28  ;;  %v10262_v28 = vand.u32 4294901760, %v9178_v7 }
  0x8d   : > { %7278 = vmatpush3.bf16.msra.mxu0 %v9036_v4  ;;  %7434 = vmatprep.subr.bf16.mxu1 %v10232_v19  ;;  %v9252_v56 = vpack.c.bf16 %v1873_v16, %v1866_v41  ;;  %v10260_v41 = vand.u32 4294901760, %v9142_v62 }
  0x8e   : > { %7312 = vmatprep.subr.bf16.mxu0 %v10252_v49  ;;  %v1901_v13 = vand.u32 4294901760, %v1900_v18 }
  0x8f   : > { %v1907_v16 = vsub.f32 %v9142_v62, %v10260_v41  ;;  %v1928_v41 = vsub.f32 %v9178_v7, %v10262_v28 }
  0x90   : > { %1205 = vmatmul.mubr.f32.vlgmr.msra.gmra.mrb[4].mxu0 %v10229_v0  ;;  %7436 = vmatpush3.bf16.msra.mxu1 %v9223_v21  ;;  %v1887_v21 = vand.u32 4294901760, %v1886_v1  ;;  %v1914_v1 = vsub.f32 %v9144_v39, %v10261_v59 }
  0x91   : > { %7314 = vmatpush3.bf16.msra.mxu0 %v8671_v40  ;;  %7437 = vmatprep.subr.bf16.mxu1 %v10232_v19  ;;  %v1908_v18 = vand.u32 4294901760, %v1907_v16  ;;  %v10263_v16 = vld [vmem:[#allocation49_spill] sm:$0xff] }
  0x92   : > { %7316 = vmatprep.subr.bf16.mxu0 %v8677_v42  ;;  %1447 = vmatprep.mubr.f32.mxu0 %v10256_v23  ;;  %v1894_v23 = vand.u32 4294901760, %v1893_v38  ;;  %v9261_v36 = vpack.c.bf16 %v1887_v21, %v1880_v35  ;;  %v1921_v38 = vsub.f32 %v9176_v29, %v1920_v44  ;;  %v1915_v35 = vand.u32 4294901760, %v1914_v1  ;;  %v10264_v1 = vld [vmem:[#allocation25_spill] sm:$0xff] }
  0x94   : > { %7439 = vmatpush3.bf16.msra.mxu1 %v9235_v54  ;;  %10259 = vst [vmem:[#allocation46_spill] sm:$0xff] %v9261_v36  ;;  %v9274_v21 = vpack.c.bf16 %v1901_v13, %v1894_v23  ;;  %v9283_v59 = vpack.c.bf16 %v1915_v35, %v1908_v18  ;;  %v1922_v44 = vand.u32 4294901760, %v1921_v38  ;;  %v9297_v13 = vpack.c.bf16 %v9085_v31, %v9080_v47  ;;  %v10266_v18 = vld [vmem:[#allocation28_spill] sm:$0xff]  ;;  %v10267_v31 = vld [vmem:[#allocation42_spill] sm:$0xff] }
  0x95   : > { %7318 = vmatpush3.bf16.msra.mxu0 %v8685_v14  ;;  %7440 = vmatprep.subr.bf16.mxu1 %v10232_v19  ;;  %v9306_v38 = vpack.c.bf16 %v9093_v12, %v9088_v17  ;;  %v10268_v47 = vand.u32 4294901760, %v10267_v31  ;;  %v9318_v35 = vpack.c.bf16 %v9097_v52, %v9095_v8  ;;  %v10269_v17 = vld [vmem:[#allocation5_spill] sm:$0xff]  ;;  %v9327_v12 = vpack.c.bf16 %v9103_v60, %v9099_v46  ;;  %v2370_v8 = vld [vmem:[%s9901_s5 + $0x8] sm:$0xff] }
  0x96   : > { %7320 = vmatprep.subr.bf16.mxu0 %v8691_v20  ;;  %v9335_v52 = vpack.c.bf16 %v9107_v11, %v9105_v32  ;;  %v9346_v46 = vpack.c.bf16 %v9116_v25, %v9114_v6  ;;  %v9351_v60 = vand.u32 4294901760, %v2370_v8  ;;  %v9356_v32 = vpack.c.bf16 %v9144_v39, %v9142_v62  ;;  %v10270_v62 = vld [vmem:[#allocation14_spill] sm:$0xff] }
  0x97   : > { %v9367_v6 = vpack.c.bf16 %v9178_v7, %v9176_v29  ;;  %v10271_v29 = vld [vmem:[#allocation29_spill] sm:$0xff] }
  0x98   : > { %7442 = vmatpush3.bf16.msra.mxu1 %v9252_v56  ;;  %v9362_v11 = vsub.f32 %v2370_v8, %v9351_v60 }
  0x99   : > { %7322 = vmatpush3.bf16.msra.mxu0 %v8697_v26  ;;  %7443 = vmatprep.subr.bf16.mxu1 %v10232_v19 }
  0x9a   : > { %7324 = vmatprep.subr.bf16.mxu0 %v8703_v30  ;;  %v10050_v25 = vand.u32 4294901760, %v9362_v11 }
  0x9c   : > { %7445 = vmatpush3.bf16.msra.mxu1 %v9261_v36  ;;  %v1929_v36 = vand.u32 4294901760, %v1928_v41  ;;  %v2475_v7 = vsub.f32 %v9362_v11, %v10050_v25  ;;  %v10282_v25 = vld [vmem:[#allocation40_spill] sm:$0xff] }
  0x9d   : > { %7326 = vmatpush3.bf16.msra.mxu0 %v8709_v24  ;;  %7446 = vmatprep.subr.bf16.mxu1 %v10232_v19 }
  0x9e   : > { %7328 = vmatprep.subr.bf16.mxu0 %v8722_v22  ;;  %v9289_v23 = vpack.c.bf16 %v1929_v36, %v1922_v44  ;;  %v10265_v36 = vld [vmem:[#allocation7_spill] sm:$0xff]  ;;  %v2476_v39 = vand.u32 4294901760, %v2475_v7  ;;  %v10274_v7 = vld [vmem:[#allocation24_spill] sm:$0xff] }
  0xa0   : > { %7448 = vmatpush3.bf16.msra.mxu1 %v9274_v21 }
  0xa1   : > { %7330 = vmatpush3.bf16.msra.mxu0 %v10203_v27  ;;  %7449 = vmatprep.subr.bf16.mxu1 %v10232_v19 }
  0xa2   : > { %7332 = vmatprep.subr.bf16.mxu0 %v10208_v57 }
  0xa4   : > { %7451 = vmatpush3.bf16.msra.mxu1 %v9283_v59 }
  0xa5   : > { %7334 = vmatpush3.bf16.msra.mxu0 %v10215_v3  ;;  %7452 = vmatprep.subr.bf16.mxu1 %v10232_v19 }
  0xa6   : > { %7336 = vmatprep.subr.bf16.mxu0 %v8966_v2 }
  0xa8   : > { %7454 = vmatpush3.bf16.msra.mxu1 %v9289_v23 }
  0xa9   : > { %7338 = vmatpush3.bf16.msra.mxu0 %v10263_v16  ;;  %7455 = vmatprep.subr.bf16.mxu1 %v10232_v19 }
  0xaa   : > { %7340 = vmatprep.subr.bf16.mxu0 %v10264_v1 }
  0xab   : > { %6743 = vmatmul.mubr.f32.vlgmr.msra.gmra.mrb[4].mxu1 %v10265_v36 }
  0xac   : > { %7457 = vmatpush3.bf16.msra.mxu1 %v9297_v13  ;;  %6777 = vmatprep.mubr.msk.f32.mxu1 %vm8112_vm2, %v10231_v43 }
  0xad   : > { %7342 = vmatpush3.bf16.msra.mxu0 %v10266_v18  ;;  %7458 = vmatprep.subr.bf16.mxu1 %v10232_v19 }
  0xae   : > { %7376 = vmatprep.subr.bf16.mxu0 %v10252_v49 }
  0xb0   : > { %1451 = vmatmul.mubr.f32.vlgmr.msra.gmra.mrb[6].mxu0 %v10268_v47  ;;  %7460 = vmatpush3.bf16.msra.mxu1 %v9306_v38  ;;  %v10272_v47 = vand.u32 4294901760, %v9067_v58 }
  0xb1   : > { %7378 = vmatpush3.bf16.msra.mxu0 %v8671_v40  ;;  %7461 = vmatprep.subr.bf16.mxu1 %v10232_v19 }
  0xb2   : > { %7380 = vmatprep.subr.bf16.mxu0 %v8677_v42  ;;  %1721 = vmatprep.mubr.f32.mxu0 %v10269_v17  ;;  %v10273_v17 = vld [vmem:[#allocation31_spill] sm:$0xff] }
  0xb4   : > { %7463 = vmatpush3.bf16.msra.mxu1 %v9318_v35 }
  0xb5   : > { %7382 = vmatpush3.bf16.msra.mxu0 %v8685_v14  ;;  %7464 = vmatprep.subr.bf16.mxu1 %v10232_v19 }
  0xb6   : > { %7384 = vmatprep.subr.bf16.mxu0 %v8691_v20 }
  0xb8   : > { %7466 = vmatpush3.bf16.msra.mxu1 %v9327_v12 }
  0xb9   : > { %7386 = vmatpush3.bf16.msra.mxu0 %v8697_v26  ;;  %7467 = vmatprep.subr.bf16.mxu1 %v10232_v19 }
  0xba   : > { %7388 = vmatprep.subr.bf16.mxu0 %v8703_v30 }
  0xbc   : > { %7469 = vmatpush3.bf16.msra.mxu1 %v9335_v52 }
  0xbd   : > { %7390 = vmatpush3.bf16.msra.mxu0 %v8709_v24  ;;  %7470 = vmatprep.subr.bf16.mxu1 %v10232_v19 }
  0xbe   : > { %7392 = vmatprep.subr.bf16.mxu0 %v8722_v22 }
  0xc0   : > { %7472 = vmatpush3.bf16.msra.mxu1 %v9346_v46 }
  0xc1   : > { %7394 = vmatpush3.bf16.msra.mxu0 %v10203_v27  ;;  %7473 = vmatprep.subr.bf16.mxu1 %v10232_v19 }
  0xc2   : > { %7396 = vmatprep.subr.bf16.mxu0 %v10208_v57 }
  0xc4   : > { %7475 = vmatpush3.bf16.msra.mxu1 %v9356_v32 }
  0xc5   : > { %7398 = vmatpush3.bf16.msra.mxu0 %v10215_v3  ;;  %7476 = vmatprep.subr.bf16.mxu1 %v10232_v19 }
  0xc6   : > { %7400 = vmatprep.subr.bf16.mxu0 %v8966_v2 }
  0xc8   : > { %7478 = vmatpush3.bf16.msra.mxu1 %v9367_v6 }
  0xc9   : > { %7402 = vmatpush3.bf16.msra.mxu0 %v10263_v16  ;;  %7479 = vmatprep.subr.bf16.mxu1 %v10232_v19 }
  0xca   : > { %7404 = vmatprep.subr.bf16.mxu0 %v10264_v1 }
  0xcb   : > { %6778 = vmatmul.mubr.f32.vlgmr.msra.gmra.mrb[4].mxu1 %v9067_v58  ;;  %v10277_v58 = vld [vmem:[#allocation52_spill] sm:$0xff] }
  0xcc   : > { %7481 = vmatpush3.bf16.msra.mxu1 %v10270_v62  ;;  %6812 = vmatprep.mubr.msk.f32.mxu1 %vm8112_vm2, %v10231_v43 }
  0xcd   : > { %7406 = vmatpush3.bf16.msra.mxu0 %v10266_v18  ;;  %7482 = vmatprep.subr.bf16.mxu1 %v10232_v19 }
  0xce   : > { %7552 = vmatprep.subr.bf16.mxu0 %v10252_v49 }
  0xd0   : > { %1723 = vmatmul.mubr.f32.vlgmr.msra.gmra.mrb[8].mxu0 %v10229_v0  ;;  %7484 = vmatpush3.bf16.msra.mxu1 %v10271_v29  ;;  %v2369_v0 = vld [vmem:[%s9901_s5] sm:$0xff] }
  0xd1   : > { %7554 = vmatpush3.bf16.msra.mxu0 %v8671_v40  ;;  %7485 = vmatprep.subr.bf16.mxu1 %v10232_v19  ;;  %v9404_v28 = vand.u32 4294901760, %v2369_v0 }
  0xd2   : > { %7556 = vmatprep.subr.bf16.mxu0 %v8677_v42  ;;  %2477 = vmatprep.mubr.f32.mxu0 %v2476_v39  ;;  %v10275_v39 = vld [vmem:[#allocation33_spill] sm:$0xff] }
  0xd3   : > { %v9411_v41 = vsub.f32 %v2369_v0, %v9404_v28  ;;  %v10276_v0 = vld [vmem:[#allocation30_spill] sm:$0xff] }
  0xd4   : > { %7487 = vmatpush3.bf16.msra.mxu1 %v9061_v33 }
  0xd5   : > { %7558 = vmatpush3.bf16.msra.mxu0 %v8685_v14  ;;  %7488 = vmatprep.subr.bf16.mxu1 %v10232_v19  ;;  %v10049_v44 = vand.u32 4294901760, %v9411_v41 }
  0xd6   : > { %7560 = vmatprep.subr.bf16.mxu0 %v8691_v20 }
  0xd7   : > { %v2481_v31 = vsub.f32 %v9411_v41, %v10049_v44  ;;  %v10280_v44 = vld [vmem:[#allocation55_spill] sm:$0xff] }
  0xd8   : > { %7490 = vmatpush3.bf16.msra.mxu1 %v9070_v61 }
  0xd9   : > { %7562 = vmatpush3.bf16.msra.mxu0 %v8697_v26  ;;  %7491 = vmatprep.subr.bf16.mxu1 %v10232_v19  ;;  %v2482_v8 = vand.u32 4294901760, %v2481_v31  ;;  %v10278_v31 = vld [vmem:[#allocation35_spill] sm:$0xff] }
  0xda   : > { %7564 = vmatprep.subr.bf16.mxu0 %v8703_v30 }
  0xdc   : > { %7493 = vmatpush3.bf16.msra.mxu1 %v9110_v5 }
  0xdd   : > { %7566 = vmatpush3.bf16.msra.mxu0 %v8709_v24  ;;  %7494 = vmatprep.subr.bf16.mxu1 %v10232_v19 }
  0xde   : > { %7568 = vmatprep.subr.bf16.mxu0 %v8722_v22 }
  0xe0   : > { %7496 = vmatpush3.bf16.msra.mxu1 %v9156_v34 }
  0xe1   : > { %7570 = vmatpush3.bf16.msra.mxu0 %v10203_v27  ;;  %7497 = vmatprep.subr.bf16.mxu1 %v10232_v19 }
  0xe2   : > { %7572 = vmatprep.subr.bf16.mxu0 %v10208_v57 }
  0xe4   : > { %7499 = vmatpush3.bf16.msra.mxu1 %v9181_v9 }
  0xe5   : > { %7574 = vmatpush3.bf16.msra.mxu0 %v10215_v3  ;;  %7500 = vmatprep.subr.bf16.mxu1 %v10232_v19 }
  0xe6   : > { %7576 = vmatprep.subr.bf16.mxu0 %v8966_v2 }
  0xe8   : > { %7502 = vmatpush3.bf16.msra.mxu1 %v9194_v48 }
  0xe9   : > { %7578 = vmatpush3.bf16.msra.mxu0 %v10263_v16  ;;  %7503 = vmatprep.subr.bf16.mxu1 %v10232_v19 }
  0xea   : > { %7580 = vmatprep.subr.bf16.mxu0 %v10264_v1 }
  0xeb   : > { %6813 = vmatmul.mubr.f32.vlgmr.msra.gmra.mrb[4].mxu1 %v10272_v47  ;;  %v10279_v47 = vld [vmem:[#allocation54_spill] sm:$0xff] }
  0xec   : > { %7505 = vmatpush3.bf16.msra.mxu1 %v10273_v17  ;;  %6847 = vmatprep.mubr.msk.f32.mxu1 %vm8112_vm2, %v10231_v43 }
  0xed   : > { %7582 = vmatpush3.bf16.msra.mxu0 %v10266_v18  ;;  %7506 = vmatprep.subr.bf16.mxu1 %v10232_v19 }
  0xee   : > { %7584 = vmatprep.subr.bf16.mxu0 %v10274_v7  ;;  %v10281_v7 = vld [vmem:[#allocation36_spill] sm:$0xff] }
  0xf0   : > { %7508 = vmatpush3.bf16.msra.mxu1 %v10275_v39  ;;  %2483 = vmatmul.mubr.f32.vlgmr.msra.gmra.mrb[10].mxu0 %v2482_v8  ;;  %v10283_v8 = vld [vmem:[#allocation57_spill] sm:$0xff] }
  0xf1   : > { %7586 = vmatpush3.bf16.msra.mxu0 %v10276_v0  ;;  %7509 = vmatprep.subr.bf16.mxu1 %v10232_v19  ;;  %v10284_v0 = vld [vmem:[#allocation38_spill] sm:$0xff] }
  0xf2   : > { %7588 = vmatprep.subr.bf16.mxu0 %v10277_v58  ;;  %2713 = vmatprep.mubr.f32.mxu0 %v9351_v60  ;;  %v10285_v58 = vld [vmem:[#allocation41_spill] sm:$0xff] }
  0xf4   : > { %7511 = vmatpush3.bf16.msra.mxu1 %v10278_v31 }
  0xf5   : > { %7590 = vmatpush3.bf16.msra.mxu0 %v10279_v47  ;;  %7512 = vmatprep.subr.bf16.mxu1 %v10232_v19  ;;  %v10286_v47 = vld [vmem:[#allocation44_spill] sm:$0xff] }
  0xf6   : > { %7592 = vmatprep.subr.bf16.mxu0 %v10280_v44 }
  0xf8   : > { %7514 = vmatpush3.bf16.msra.mxu1 %v10281_v7 }
  0xf9   : > { %7594 = vmatpush3.bf16.msra.mxu0 %v10282_v25  ;;  %7515 = vmatprep.subr.bf16.mxu1 %v10232_v19  ;;  %v10294_v25 = vld [vmem:[#allocation20_spill] sm:$0xff] }
  0xfa   : > { %7596 = vmatprep.subr.bf16.mxu0 %v10283_v8  ;;  %v10295_v8 = vld [vmem:[#allocation26_spill] sm:$0xff] }
  0xfc   : > { %7517 = vmatpush3.bf16.msra.mxu1 %v10284_v0 }
  0xfd   : > { %7598 = vmatpush3.bf16.msra.mxu0 %v10285_v58  ;;  %7518 = vmatprep.subr.bf16.mxu1 %v10232_v19 }
  0xfe   : > { %7600 = vmatprep.subr.bf16.mxu0 %v8919_v51  ;;  %v10287_v51 = vld [vmem:[#allocation8_spill] sm:$0xff] }
 0x100   : > { %7520 = vmatpush3.bf16.msra.mxu1 %v9170_v10 }
 0x101   : > { %7602 = vmatpush3.bf16.msra.mxu0 %v10286_v47  ;;  %7521 = vmatprep.subr.bf16.mxu1 %v10232_v19 }
 0x102   : > { %7604 = vmatprep.subr.bf16.mxu0 %v8945_v55  ;;  %v10288_v55 = vld [vmem:[#allocation9_spill] sm:$0xff] }
 0x104   : > { %7523 = vmatpush3.bf16.msra.mxu1 %v9191_v45 }
 0x105   : > { %7606 = vmatpush3.bf16.msra.mxu0 %v8969_v15  ;;  %7524 = vmatprep.subr.bf16.mxu1 %v10232_v19  ;;  %v10290_v15 = vld [vmem:[#allocation11_spill] sm:$0xff] }
 0x106   : > { %7608 = vmatprep.subr.bf16.mxu0 %v8971_v53  ;;  %v10291_v53 = vld [vmem:[#allocation12_spill] sm:$0xff] }
 0x108   : > { %7526 = vmatpush3.bf16.msra.mxu1 %v9208_v63 }
 0x109   : > { %7610 = vmatpush3.bf16.msra.mxu0 %v8998_v50  ;;  %7527 = vmatprep.subr.bf16.mxu1 %v10232_v19  ;;  %v10293_v50 = vld [vmem:[#allocation16_spill] sm:$0xff] }
 0x10a   : > { %7612 = vmatprep.subr.bf16.mxu0 %v9009_v37  ;;  %v10289_v37 = vld [vmem:[#allocation10_spill] sm:$0xff] }
 0x10b   : > { %6848 = vmatmul.mubr.f32.vlgmr.msra.gmra.mrb[4].mxu1 %v10265_v36 }
 0x10c   : > { %7529 = vmatpush3.bf16.msra.mxu1 %v10270_v62  ;;  %6882 = vmatprep.mubr.msk.f32.mxu1 %vm8112_vm2, %v10231_v43 }
 0x10d   : > { %7614 = vmatpush3.bf16.msra.mxu0 %v9036_v4  ;;  %7530 = vmatprep.subr.bf16.mxu1 %v10232_v19  ;;  %v10292_v4 = vld [vmem:[#allocation13_spill] sm:$0xff] }
 0x10e   : > { %7616 = vmatprep.subr.bf16.mxu0 %v10287_v51  ;;  %v10296_v51 = vld [vmem:[#allocation32_spill] sm:$0xff] }
 0x110   : > { %7532 = vmatpush3.bf16.msra.mxu1 %v10271_v29  ;;  %2715 = vmatmul.mubr.f32.vlgmr.msra.gmra.mrb[12].mxu0 %v9404_v28 }
 0x111   : > { %7618 = vmatpush3.bf16.msra.mxu0 %v10288_v55  ;;  %7533 = vmatprep.subr.bf16.mxu1 %v10232_v19  ;;  %v10297_v55 = vld [vmem:[#allocation34_spill] sm:$0xff] }
 0x112   : > { %7620 = vmatprep.subr.bf16.mxu0 %v10289_v37  ;;  %2850 = vmatprep.mubr.f32.mxu0 %v9362_v11 }
 0x114   : > { %7535 = vmatpush3.bf16.msra.mxu1 %v9061_v33 }
 0x115   : > { %7622 = vmatpush3.bf16.msra.mxu0 %v10290_v15  ;;  %7536 = vmatprep.subr.bf16.mxu1 %v10232_v19 }
 0x116   : > { %7624 = vmatprep.subr.bf16.mxu0 %v10291_v53  ;;  %v10298_v53 = vld [vmem:[#allocation37_spill] sm:$0xff] }
 0x117   : > { %v6105_v44 = vpop.f32.mrb[0].mxu1 }
 0x118   : > { %7538 = vmatpush3.bf16.msra.mxu1 %v9070_v61  ;;  %v6106_v58 = vpop.f32.mrb[1].mxu1 }
 0x119   : > { %7626 = vmatpush3.bf16.msra.mxu0 %v10292_v4  ;;  %7539 = vmatprep.subr.bf16.mxu1 %v10232_v19  ;;  %v9490_v47 = vadd.f32 %v6106_v58, %v6105_v44  ;;  %v10299_v4 = vld [vmem:[#allocation39_spill] sm:$0xff] }
 0x11a   : > { %7628 = vmatprep.subr.bf16.mxu0 %v10293_v50  ;;  %v10300_v50 = vld [vmem:[#allocation43_spill] sm:$0xff] }
 0x11b   : > { %v10302_v44 = vld [vmem:[#allocation47_spill] sm:$0xff] }
 0x11c   : > { %7541 = vmatpush3.bf16.msra.mxu1 %v9110_v5 }
 0x11d   : > { %7630 = vmatpush3.bf16.msra.mxu0 %v10294_v25  ;;  %7542 = vmatprep.subr.bf16.mxu1 %v10232_v19  ;;  %v10301_v25 = vld [vmem:[#allocation45_spill] sm:$0xff] }
 0x11e   : > { %7632 = vmatprep.subr.bf16.mxu0 %v10295_v8  ;;  %v9496_v37 = vpop.f32.mrb[0].mxu0  ;;  %v2371_v8 = vld [vmem:[%s9901_s5 + $0x10] sm:$0xff] }
 0x11f   : > { %v9499_v15 = vpop.f32.mrb[1].mxu0  ;;  %v9529_v58 = vand.u32 4294901760, %v2371_v8 }
 0x120   : > { %7544 = vmatpush3.bf16.msra.mxu1 %v9156_v34 }
 0x121   : > { %7634 = vmatpush3.bf16.msra.mxu0 %v10296_v51  ;;  %7545 = vmatprep.subr.bf16.mxu1 %v10232_v19 }
 0x122   : > { %7636 = vmatprep.subr.bf16.mxu0 %v10297_v55 }
 0x124   : > { %7547 = vmatpush3.bf16.msra.mxu1 %v9181_v9 }
 0x125   : > { %7638 = vmatpush3.bf16.msra.mxu0 %v10298_v53  ;;  %7548 = vmatprep.subr.bf16.mxu1 %v10232_v19 }
 0x126   : > { %7640 = vmatprep.subr.bf16.mxu0 %v10299_v4 }
 0x128   : > { %7550 = vmatpush3.bf16.msra.mxu1 %v9194_v48 }
 0x129   : > { %7642 = vmatpush3.bf16.msra.mxu0 %v10300_v50  ;;  %7743 = vmatprep.subr.bf16.mxu1 %v10232_v19 }
 0x12a   : > { %7644 = vmatprep.subr.bf16.mxu0 %v10301_v25 }
 0x12b   : > { %6883 = vmatmul.mubr.f32.vlgmr.msra.gmra.mrb[4].mxu1 %v10265_v36  ;;  %v10303_v36 = vand.u32 4294901760, %v9362_v11  ;;  %v9536_v11 = vsub.f32 %v2371_v8, %v9529_v58 }
 0x12c   : > { %7745 = vmatpush3.bf16.msra.mxu1 %v10270_v62  ;;  %6917 = vmatprep.mubr.msk.f32.mxu1 %vm8112_vm2, %v10231_v43 }
 0x12d   : > { %7646 = vmatpush3.bf16.msra.mxu0 %v10302_v44  ;;  %7746 = vmatprep.subr.bf16.mxu1 %v10232_v19  ;;  %v10051_v53 = vand.u32 4294901760, %v9536_v11 }
 0x12e   : > { %7648 = vmatprep.subr.bf16.mxu0 %v10252_v49 }
 0x12f   : > { %v3322_v50 = vsub.f32 %v9536_v11, %v10051_v53 }
 0x130   : > { %7748 = vmatpush3.bf16.msra.mxu1 %v10271_v29  ;;  %2853 = vmatmul.mubr.f32.vlgmr.msra.gmra.mrb[14].mxu0 %v9411_v41 }
 0x131   : > { %7650 = vmatpush3.bf16.msra.mxu0 %v8671_v40  ;;  %7749 = vmatprep.subr.bf16.mxu1 %v10232_v19  ;;  %v3323_v8 = vand.u32 4294901760, %v3322_v50  ;;  %v10306_v50 = vand.u32 4294901760, %v9411_v41  ;;  %v10312_v41 = vld [vmem:[#allocation18_spill] sm:$0xff] }
 0x132   : > { %7652 = vmatprep.subr.bf16.mxu0 %v8677_v42  ;;  %2957 = vmatprep.mubr.f32.mxu0 %v10303_v36 }
 0x134   : > { %7751 = vmatpush3.bf16.msra.mxu1 %v9061_v33 }
 0x135   : > { %7654 = vmatpush3.bf16.msra.mxu0 %v8685_v14  ;;  %7752 = vmatprep.subr.bf16.mxu1 %v10232_v19 }
 0x136   : > { %7656 = vmatprep.subr.bf16.mxu0 %v8691_v20 }
 0x138   : > { %7754 = vmatpush3.bf16.msra.mxu1 %v9070_v61 }
 0x139   : > { %7658 = vmatpush3.bf16.msra.mxu0 %v8697_v26  ;;  %7755 = vmatprep.subr.bf16.mxu1 %v10232_v19 }
 0x13a   : > { %7660 = vmatprep.subr.bf16.mxu0 %v8703_v30 }
 0x13c   : > { %7757 = vmatpush3.bf16.msra.mxu1 %v9110_v5 }
 0x13d   : > { %7662 = vmatpush3.bf16.msra.mxu0 %v8709_v24  ;;  %7758 = vmatprep.subr.bf16.mxu1 %v10232_v19  ;;  %v6175_v51 = vpop.f32.mrb[2].mxu1 }
 0x13e   : > { %7664 = vmatprep.subr.bf16.mxu0 %v8722_v22  ;;  %v6176_v55 = vpop.f32.mrb[3].mxu1 }
 0x13f   : > { %v9543_v4 = vadd.f32 %v6176_v55, %v6175_v51  ;;  %v10304_v51 = vld [vmem:[#allocation61_spill] sm:$0xff]  ;;  %v10305_v55 = vld [vmem:[#allocation48_spill] sm:$0xff] }
 0x140   : > { %7760 = vmatpush3.bf16.msra.mxu1 %v9156_v34 }
 0x141   : > { %7666 = vmatpush3.bf16.msra.mxu0 %v10203_v27  ;;  %7761 = vmatprep.subr.bf16.mxu1 %v10232_v19 }
 0x142   : > { %7668 = vmatprep.subr.bf16.mxu0 %v10208_v57 }
 0x143   : > { %v6035_v25 = vpop.f32.mrb[2].mxu0 }
 0x144   : > { %7763 = vmatpush3.bf16.msra.mxu1 %v9181_v9  ;;  %v6036_v44 = vpop.f32.mrb[3].mxu0 }
 0x145   : > { %7670 = vmatpush3.bf16.msra.mxu0 %v10215_v3  ;;  %7764 = vmatprep.subr.bf16.mxu1 %v10232_v19  ;;  %v6037_v36 = vadd.f32 %v6036_v44, %v6035_v25  ;;  %v10307_v25 = vld [vmem:[#allocation62_spill] sm:$0xff] }
 0x146   : > { %7672 = vmatprep.subr.bf16.mxu0 %v8966_v2  ;;  %v10308_v44 = vld [vmem:[#allocation50_spill] sm:$0xff] }
 0x148   : > { %7766 = vmatpush3.bf16.msra.mxu1 %v9194_v48 }
 0x149   : > { %7674 = vmatpush3.bf16.msra.mxu0 %v10263_v16  ;;  %7767 = vmatprep.subr.bf16.mxu1 %v10232_v19 }
 0x14a   : > { %7676 = vmatprep.subr.bf16.mxu0 %v10264_v1 }
 0x14b   : > { %6918 = vmatmul.mubr.f32.vlgmr.msra.gmra.mrb[6].mxu1 %v3323_v8  ;;  %v10309_v8 = vld [vmem:[#allocation15_spill] sm:$0xff] }
 0x14c   : > { %7769 = vmatpush3.bf16.msra.mxu1 %v10304_v51  ;;  %6952 = vmatprep.mubr.msk.f32.mxu1 %vm8112_vm2, %v10231_v43  ;;  %v10310_v51 = vld [vmem:[#allocation17_spill] sm:$0xff] }
 0x14d   : > { %7678 = vmatpush3.bf16.msra.mxu0 %v10266_v18  ;;  %7770 = vmatprep.subr.bf16.mxu1 %v10232_v19 }
 0x14e   : > { %7680 = vmatprep.subr.bf16.mxu0 %v10305_v55  ;;  %v10311_v55 = vld [vmem:[#allocation21_spill] sm:$0xff] }
 0x150   : > { %2961 = vmatmul.mubr.f32.vlgmr.msra.gmra.mrb[16].mxu0 %v10306_v50  ;;  %7772 = vmatpush3.bf16.msra.mxu1 %v10307_v25  ;;  %v10313_v50 = vld [vmem:[#allocation19_spill] sm:$0xff]  ;;  %v9581_v25 = vpop.permute.xlu0 %2373 }
 0x151   : > { %7682 = vmatpush3.bf16.msra.mxu0 %v10308_v44  ;;  %7773 = vmatprep.subr.bf16.mxu1 %v10232_v19  ;;  %v10314_v44 = vld [vmem:[#allocation46_spill] sm:$0xff] }
 0x152   : > { %7684 = vmatprep.subr.bf16.mxu0 %v10309_v8  ;;  %3127 = vmatprep.mubr.f32.mxu0 %v9351_v60  ;;  %v10315_v8 = vld [vmem:[#allocation51_spill] sm:$0xff] }
 0x154   : > { %7775 = vmatpush3.bf16.msra.mxu1 %v9235_v54  ;;  %v10316_v54 = vld [vmem:[#allocation23_spill] sm:$0xff] }
 0x155   : > { %7686 = vmatpush3.bf16.msra.mxu0 %v10310_v51  ;;  %7776 = vmatprep.subr.bf16.mxu1 %v10232_v19  ;;  %v864_v51 = vpop.permute.xlu0 %863 }
 0x156   : > { %7688 = vmatprep.subr.bf16.mxu0 %v10311_v55  ;;  %v10318_v55 = vld [vmem:[#allocation53_spill] sm:$0xff] }
 0x158   : > { %7778 = vmatpush3.bf16.msra.mxu1 %v9252_v56  ;;  %v10317_v56 = vld [vmem:[#allocation27_spill] sm:$0xff] }
 0x159   : > { %7690 = vmatpush3.bf16.msra.mxu0 %v10312_v41  ;;  %7779 = vmatprep.subr.bf16.mxu1 %v10232_v19 }
 0x15a   : > { %7692 = vmatprep.subr.bf16.mxu0 %v10313_v50  ;;  %v975_v50 = vadd.f32 %v6037_v36, %v864_v51  ;;  %v10322_v36 = vld [vmem:[#allocation60_spill] sm:$0xff]  ;;  %v3941_v51 = vld [vmem:[%s9903_s7] sm:$0xf] }
 0x15c   : > { %7781 = vmatpush3.bf16.msra.mxu1 %v10314_v44 }
 0x15d   : > { %7694 = vmatpush3.bf16.msra.mxu0 %v10315_v8  ;;  %7782 = vmatprep.subr.bf16.mxu1 %v10232_v19  ;;  %v10319_v8 = vld [vmem:[#allocation56_spill] sm:$0xff] }
 0x15e   : > { %7696 = vmatprep.subr.bf16.mxu0 %v10316_v54  ;;  %v10320_v54 = vld [vmem:[#allocation58_spill] sm:$0xff] }
 0x160   : > { %7784 = vmatpush3.bf16.msra.mxu1 %v9274_v21 }
 0x161   : > { %7698 = vmatpush3.bf16.msra.mxu0 %v10317_v56  ;;  %7785 = vmatprep.subr.bf16.mxu1 %v10232_v19  ;;  %v10321_v56 = vld [vmem:[#allocation59_spill] sm:$0xff] }
 0x162   : > { %7700 = vmatprep.subr.bf16.mxu0 %v10318_v55 }
 0x163   : > { %v6070_v41 = vpop.f32.mrb[4].mxu0 }
 0x164   : > { %v6071_v53 = vpop.f32.mrb[5].mxu0  ;;  %7787 = vmatpush3.bf16.msra.mxu1 %v9283_v59  ;;  %v10323_v59 = vld [vmem:[#allocation22_spill] sm:$0xff] }
 0x165   : > { %v6072_v44 = vadd.f32 %v6071_v53, %v6070_v41  ;;  %7702 = vmatpush3.bf16.msra.mxu0 %v10319_v8  ;;  %7788 = vmatprep.subr.bf16.mxu1 %v10232_v19  ;;  %v3947_v41 = vsel %vm3945_vm3, %v3941_v51, 0 }
 0x166   : > { %7704 = vmatprep.subr.bf16.mxu0 %v10320_v54 }
 0x167   : > { %v1207_v21 = vadd.f32 %v6072_v44, %v975_v50  ;;  %v9709_v50 = vand.u32 4294901760, %v3947_v41 }
 0x168   : > { %7790 = vmatpush3.bf16.msra.mxu1 %v9289_v23 }
 0x169   : > { %7706 = vmatpush3.bf16.msra.mxu0 %v10321_v56  ;;  %7791 = vmatprep.subr.bf16.mxu1 %v10232_v19  ;;  %v1345_v55 = vadd.f32 %v9490_v47, %v1207_v21 }
 0x16a   : > { %7708 = vmatprep.subr.bf16.mxu0 %v10322_v36 }
 0x16b   : > { %6953 = vmatmul.mubr.f32.vlgmr.msra.gmra.mrb[6].mxu1 %v9529_v58 }
 0x16c   : > { %7793 = vmatpush3.bf16.msra.mxu1 %v9297_v13  ;;  %6987 = vmatprep.mubr.msk.f32.mxu1 %vm8112_vm2, %v10231_v43 }
 0x16d   : > { %7710 = vmatpush3.bf16.msra.mxu0 %v10323_v59  ;;  %7794 = vmatprep.subr.bf16.mxu1 %v10232_v19 }
 0x16e   : > { %7712 = vmatprep.subr.bf16.mxu0 %v10252_v49 }
 0x170   : > { %3129 = vmatmul.mubr.f32.vlgmr.msra.gmra.mrb[18].mxu0 %v9404_v28  ;;  %7796 = vmatpush3.bf16.msra.mxu1 %v9306_v38 }
 0x171   : > { %7714 = vmatpush3.bf16.msra.mxu0 %v8671_v40  ;;  %7797 = vmatprep.subr.bf16.mxu1 %v10232_v19 }
 0x172   : > { %7716 = vmatprep.subr.bf16.mxu0 %v8677_v42  ;;  %3231 = vmatprep.mubr.f32.mxu0 %v9351_v60 }
 0x174   : > { %7799 = vmatpush3.bf16.msra.mxu1 %v9318_v35 }
 0x175   : > { %7718 = vmatpush3.bf16.msra.mxu0 %v8685_v14  ;;  %7800 = vmatprep.subr.bf16.mxu1 %v10232_v19 }
 0x176   : > { %7720 = vmatprep.subr.bf16.mxu0 %v8691_v20 }
 0x178   : > { %7802 = vmatpush3.bf16.msra.mxu1 %v9327_v12 }
 0x179   : > { %7722 = vmatpush3.bf16.msra.mxu0 %v8697_v26  ;;  %7803 = vmatprep.subr.bf16.mxu1 %v10232_v19 }
 0x17a   : > { %7724 = vmatprep.subr.bf16.mxu0 %v8703_v30 }
 0x17c   : > { %7805 = vmatpush3.bf16.msra.mxu1 %v9335_v52 }
 0x17d   : > { %7726 = vmatpush3.bf16.msra.mxu0 %v8709_v24  ;;  %7806 = vmatprep.subr.bf16.mxu1 %v10232_v19 }
 0x17e   : > { %7728 = vmatprep.subr.bf16.mxu0 %v8722_v22 }
 0x180   : > { %7808 = vmatpush3.bf16.msra.mxu1 %v9346_v46 }
 0x181   : > { %7730 = vmatpush3.bf16.msra.mxu0 %v10203_v27  ;;  %7809 = vmatprep.subr.bf16.mxu1 %v10232_v19 }
 0x182   : > { %7732 = vmatprep.subr.bf16.mxu0 %v10208_v57 }
 0x183   : > { %v6140_v42 = vpop.f32.mrb[6].mxu0 }
 0x184   : > { %v6141_v40 = vpop.f32.mrb[7].mxu0  ;;  %7811 = vmatpush3.bf16.msra.mxu1 %v9356_v32 }
 0x185   : > { %v6142_v14 = vadd.f32 %v6141_v40, %v6140_v42  ;;  %7734 = vmatpush3.bf16.msra.mxu0 %v10215_v3  ;;  %7812 = vmatprep.subr.bf16.mxu1 %v10232_v19 }
 0x186   : > { %7736 = vmatprep.subr.bf16.mxu0 %v8966_v2  ;;  %v10324_v2 = vand.u32 4294901760, %v9536_v11 }
 0x187   : > { %v1453_v20 = vadd.f32 %v6142_v14, %v1345_v55 }
 0x188   : > { %7814 = vmatpush3.bf16.msra.mxu1 %v9367_v6 }
 0x189   : > { %7738 = vmatpush3.bf16.msra.mxu0 %v10263_v16  ;;  %7815 = vmatprep.subr.bf16.mxu1 %v10232_v19  ;;  %v1621_v26 = vadd.f32 %v9543_v4, %v1453_v20 }
 0x18a   : > { %7740 = vmatprep.subr.bf16.mxu0 %v10264_v1 }
 0x18b   : > { %6988 = vmatmul.mubr.f32.vlgmr.msra.gmra.mrb[6].mxu1 %v9536_v11 }
 0x18c   : > { %7817 = vmatpush3.bf16.msra.mxu1 %v10270_v62  ;;  %7022 = vmatprep.mubr.msk.f32.mxu1 %vm8112_vm2, %v10231_v43 }
 0x18d   : > { %7742 = vmatpush3.bf16.msra.mxu0 %v10266_v18  ;;  %7818 = vmatprep.subr.bf16.mxu1 %v10232_v19 }
 0x18e   : > { %7095 = vmatprep.subr.mxu0 %v10231_v43 }
 0x190   : > { %3233 = vmatmul.mubr.f32.vlgmr.msra.gmra.mrb[20].mxu0 %v9404_v28  ;;  %7820 = vmatpush3.bf16.msra.mxu1 %v10271_v29 }
 0x191   : > { %7821 = vmatprep.subr.bf16.mxu1 %v10232_v19  ;;  %7097 = vmatprep.mubr.msk.f32.mxu0 %vm8112_vm2, %v10231_v43 }
 0x192   : > { %7096 = vmatpush3.msra.mxu0 %v9709_v50 }
 0x193   : > { %7100 = vmatprep.subr.mxu0 %v10231_v43 }
 0x194   : > { %7823 = vmatpush3.bf16.msra.mxu1 %v9061_v33 }
 0x195   : > { %7824 = vmatprep.subr.bf16.mxu1 %v10232_v19 }
 0x198   : > { %7826 = vmatpush3.bf16.msra.mxu1 %v9070_v61 }
 0x199   : > { %7827 = vmatprep.subr.bf16.mxu1 %v10232_v19 }
 0x19c   : > { %7829 = vmatpush3.bf16.msra.mxu1 %v9110_v5 }
 0x19d   : > { %7830 = vmatprep.subr.bf16.mxu1 %v10232_v19 }
 0x1a0   : > { %7832 = vmatpush3.bf16.msra.mxu1 %v9156_v34 }
 0x1a1   : > { %7833 = vmatprep.subr.bf16.mxu1 %v10232_v19 }
 0x1a3   : > { %v6210_v30 = vpop.f32.mrb[8].mxu0 }
 0x1a4   : > { %v6211_v24 = vpop.f32.mrb[9].mxu0  ;;  %7835 = vmatpush3.bf16.msra.mxu1 %v9181_v9 }
 0x1a5   : > { %v6212_v22 = vadd.f32 %v6211_v24, %v6210_v30  ;;  %7836 = vmatprep.subr.bf16.mxu1 %v10232_v19 }
 0x1a7   : > { %v1725_v27 = vadd.f32 %v6212_v22, %v1621_v26 }
 0x1a8   : > { %7838 = vmatpush3.bf16.msra.mxu1 %v9194_v48 }
 0x1a9   : > { %7839 = vmatprep.subr.bf16.mxu1 %v10232_v19 }
 0x1ab   : > { %7023 = vmatmul.mubr.f32.vlgmr.msra.gmra.mrb[6].mxu1 %v10324_v2 }
 0x1ac   : > { %7841 = vmatpush3.bf16.msra.mxu1 %v10273_v17  ;;  %7057 = vmatprep.mubr.msk.f32.mxu1 %vm8112_vm2, %v10231_v43 }
 0x1ad   : > { %7842 = vmatprep.subr.bf16.mxu1 %v10232_v19 }
 0x1b0   : > { %7844 = vmatpush3.bf16.msra.mxu1 %v10275_v39  ;;  %v8114_v39 = vmov 2  }
 0x1b1   : > { %7845 = vmatprep.subr.bf16.mxu1 %v10232_v19 }
 0x1b4   : > { %7847 = vmatpush3.bf16.msra.mxu1 %v10278_v31  ;;  %v10325_v31 = vmov 1  }
 0x1b5   : > { %7848 = vmatprep.subr.bf16.mxu1 %v10232_v19 }
 0x1b8   : > { %7850 = vmatpush3.bf16.msra.mxu1 %v10281_v7  ;;  %v8115_v7 = vmov 3  }
 0x1b9   : > { %7851 = vmatprep.subr.bf16.mxu1 %v10232_v19 }
 0x1bc   : > { %7853 = vmatpush3.bf16.msra.mxu1 %v10284_v0  ;;  %v10326_v0 = vmov 0  }
 0x1bd   : > { %7854 = vmatprep.subr.bf16.mxu1 %v10232_v19 }
 0x1c0   : > { %7856 = vmatpush3.bf16.msra.mxu1 %v9170_v10 }
 0x1c1   : > { %7857 = vmatprep.subr.bf16.mxu1 %v10232_v19 }
 0x1c3   : > { %v6347_v57 = vpop.f32.mrb[10].mxu0 }
 0x1c4   : > { %7859 = vmatpush3.bf16.msra.mxu1 %v9191_v45  ;;  %v6348_v3 = vpop.f32.mrb[11].mxu0 }
 0x1c5   : > { %7860 = vmatprep.subr.bf16.mxu1 %v10232_v19  ;;  %v6349_v49 = vadd.f32 %v6348_v3, %v6347_v57 }
 0x1c7   : > { %v2485_v10 = vadd.f32 %v6349_v49, %v9581_v25 }
 0x1c8   : > { %7862 = vmatpush3.bf16.msra.mxu1 %v9208_v63 }
 0x1c9   : > { %7863 = vmatprep.subr.bf16.mxu1 %v10232_v19 }
 0x1cb   : > { %7058 = vmatmul.mubr.f32.vlgmr.msra.gmra.mrb[6].mxu1 %v9529_v58 }
 0x1cc   : > { %7865 = vmatpush3.bf16.msra.mxu1 %v10270_v62  ;;  %7092 = vmatprep.mubr.msk.f32.mxu1 %vm8112_vm2, %v10231_v43 }
 0x1cd   : > { %7866 = vmatprep.subr.bf16.mxu1 %v10232_v19 }
 0x1d0   : > { %7868 = vmatpush3.bf16.msra.mxu1 %v10271_v29 }
 0x1d1   : > { %7869 = vmatprep.subr.bf16.mxu1 %v10232_v19 }
 0x1d4   : > { %7871 = vmatpush3.bf16.msra.mxu1 %v9061_v33 }
 0x1d5   : > { %7872 = vmatprep.subr.bf16.mxu1 %v10232_v19 }
 0x1d8   : > { %7874 = vmatpush3.bf16.msra.mxu1 %v9070_v61 }
 0x1d9   : > { %7875 = vmatprep.subr.bf16.mxu1 %v10232_v19 }
 0x1dc   : > { %7877 = vmatpush3.bf16.msra.mxu1 %v9110_v5 }
 0x1dd   : > { %7878 = vmatprep.subr.bf16.mxu1 %v10232_v19 }
 0x1e0   : > { %7880 = vmatpush3.bf16.msra.mxu1 %v9156_v34 }
 0x1e1   : > { %7881 = vmatprep.subr.bf16.mxu1 %v10232_v19 }
 0x1e3   : > { %v6382_v45 = vpop.f32.mrb[12].mxu0 }
 0x1e4   : > { %7883 = vmatpush3.bf16.msra.mxu1 %v9181_v9  ;;  %v6383_v33 = vpop.f32.mrb[13].mxu0 }
 0x1e5   : > { %7884 = vmatprep.subr.bf16.mxu1 %v10232_v19  ;;  %v6384_v63 = vadd.f32 %v6383_v33, %v6382_v45 }
 0x1e7   : > { %v2717_v61 = vadd.f32 %v6384_v63, %v2485_v10 }
 0x1e8   : > { %7886 = vmatpush3.bf16.msra.mxu1 %v9194_v48 }
 0x1eb   : > { %7093 = vmatmul.mubr.f32.vlgmr.msra.gmra.mrb[6].mxu1 %v9529_v58 }
 0x1fe   : > { %v2365_v5 = vpop.f32.mrb[4].mxu1 }
 0x1ff   : > { %v7889_v23 = vadd.f32 %v2365_v5, %v1725_v27  ;;  %v6884_v13 = vpop.f32.mrb[5].mxu1 }
 0x203   : > { %v6417_v34 = vpop.f32.mrb[14].mxu0 }
 0x204   : > { %v6418_v16 = vpop.f32.mrb[15].mxu0 }
 0x205   : > { %v6419_v1 = vadd.f32 %v6418_v16, %v6417_v34 }
 0x207   : > { %v2855_v38 = vadd.f32 %v6419_v1, %v2717_v61 }
 0x223   : > { %v6452_v18 = vpop.f32.mrb[16].mxu0 }
 0x224   : > { %v6453_v35 = vpop.f32.mrb[17].mxu0 }
 0x225   : > { %v6454_v12 = vadd.f32 %v6453_v35, %v6452_v18 }
 0x227   : > { %v2963_v9 = vadd.f32 %v6454_v12, %v2855_v38  ;;  %v327_v38 = vld [vmem:[%s9899_s3] sm:$0xff] }
 0x243   : > { %v6487_v52 = vpop.f32.mrb[18].mxu0 }
 0x244   : > { %v6488_v46 = vpop.f32.mrb[19].mxu0 }
 0x245   : > { %v6489_v19 = vadd.f32 %v6488_v46, %v6487_v52 }
 0x247   : > { %v3131_v60 = vadd.f32 %v6489_v19, %v2963_v9 }
 0x263   : > { %v6522_v32 = vpop.f32.mrb[20].mxu0 }
 0x264   : > { %v6523_v6 = vpop.f32.mrb[21].mxu0 }
 0x265   : > { %v6524_v48 = vadd.f32 %v6523_v6, %v6522_v32 }
 0x267   : > { %v3235_v62 = vadd.f32 %v6524_v48, %v3131_v60 }
 0x2be   : > { %v3875_v29 = vpop.f32.mrb[6].mxu1 }
 0x2bf   : > { %v7890_v28 = vadd.f32 %v3875_v29, %v3235_v62  ;;  %v7094_v17 = vpop.f32.mrb[7].mxu1 }
 0x2c1   : > { %3881 = vperm.xlu0 %8016, %v7890_v28   ;;  %3886 = vperm.xlu1 %8017, %v7890_v28  }
 0x2c5   : > { %8018 = vset.pattern.permute.xlu1 %v8114_v39  ;;  %8021 = vset.pattern.permute.xlu0 %v10325_v31 }
 0x2c6   : > { %3891 = vperm.xlu1 %8018, %v7890_v28  }
 0x2ca   : > { %8019 = vset.pattern.permute.xlu1 %v8115_v7 }
 0x2cb   : > { %3896 = vperm.xlu1 %8019, %v7890_v28  }
 0x2cf   : > { %8020 = vset.pattern.permute.xlu1 %v10326_v0 }
 0x340   : > { %v3887_v47 = vpop.permute.xlu1 %3886  ;;  %v3882_v44 = vpop.permute.xlu0 %3881 }
 0x341   : > { %v3889_v58 = vadd.f32 %v7889_v23, %v3887_v47  ;;  %v3884_v54 = vadd.f32 %v7889_v23, %v3882_v44 }
 0x343   : > { %3901 = vrot.lane.b32.xlu1 %v3889_v58, %s8116_s13  ;;  %s6002_s13 = sshll.u32 %s8190_s9, 8  ;;  %s5901_s9 = scalar_lea.sflag [#allocation3], %s311_s10 }
 0x345   : > { %v3892_v11 = vpop.permute.xlu1 %3891 }
 0x346   : > { %v3894_v53 = vadd.f32 %v7889_v23, %v3892_v11 }
 0x348   : > { %3905 = vrot.lane.b32.xlu0 %v3894_v53, %s8117_s17  ;;  %s313_s17 = scalar_lea.vmem [#allocation2], %s5990_s12 }
 0x34a   : > { %v3897_v4 = vpop.permute.xlu1 %3896 }
 0x34b   : > { %v3899_v25 = vadd.f32 %v7889_v23, %v3897_v4  ;;  %v9715_v23 = vsub.f32 %v3947_v41, %v9709_v50 }
 0x34d   : > { %3909 = vrot.lane.b32.xlu1 %v3899_v25, %s8118_s18  ;;  %v9719_v1 = vand.u32 4294901760, %v9715_v23  ;;  %s5915_s18 = sshll.u32 %s313_s17, 4  ;;  %s9856_s18 = int_to_ptr.vmem [resolvable:$true] %s5915_s18 }
 0x34e   : > { %p8052_p0 = scmp.lt.s32.totalorder %s9856_s18, %s8050_s24 }
 0x34f   : > { %v4029_v12 = vsub.f32 %v9715_v23, %v9719_v1 }
 0x351   : > { %v9726_v46 = vand.u32 4294901760, %v4029_v12 }
 0x3b5   : > { %v3902_v8 = vpop.permute.xlu1 %3901 }
 0x3b6   : > { %v3913_v56 = vsel %vm3912_vm4, %v3884_v54, %v3902_v8 }
 0x3ba   : > { %v3906_v21 = vpop.permute.xlu0 %3905 }
 0x3bb   : > { %v3915_v55 = vsel %vm3914_vm5, %v3913_v56, %v3906_v21 }
 0x3bf   : > { %v3910_v36 = vpop.permute.xlu1 %3909 }
 0x3c0   : > { %v3917_v59 = vsel %vm3916_vm6, %v3915_v55, %v3910_v36 }
 0x3c1   : > { %vm3918_vm8 = vcmp.ge.f32.partialorder %v3917_v59, 0.0  ;;  %v3919_v42 = vmul.f32 0.2, %v3917_v59 }
 0x3c3   : > { %v3920_v40 = vsel %vm3918_vm8, %v3917_v59, %v3919_v42 }
 0x3c4   : > { %v3922_v14 = vsel %vm3921_vm7, %v3920_v40, -inf }
 0x3c5   : > { %v3923_v20 = vrot.slane %v3922_v14, 4 }
 0x3c7   : > { %v3924_v26 = vmax.f32 %v3922_v14, %v3923_v20 }
 0x3c9   : > { %v3925_v30 = vrot.slane %v3924_v26, 2 }
 0x3cb   : > { %v3926_v24 = vmax.f32 %v3924_v26, %v3925_v30 }
 0x3cd   : > { %v3927_v22 = vrot.slane %v3926_v24, 1 }
 0x3cf   : > { %v3928_v27 = vmax.f32 %v3926_v24, %v3927_v22 }
 0x3d1   : > { %v3929_v2 = vsub.f32 %v3920_v40, %v3928_v27 }
 0x3d3   : > { %v3930_v57 = vmul.f32 1.442695, %v3929_v2 }
 0x3d5   : > { %8037 = vpow2.f32 %v3930_v57 }
 0x3df   : > { %v8038_v3 = vpop.eup %8037 }
 0x3e0   : > { %v3932_v49 = vsel %vm3921_vm7, %v8038_v3, 0.0 }
 0x3e1   : > { %v3933_v10 = vrot.slane %v3932_v49, 4 }
 0x3e3   : > { %v3934_v45 = vadd.f32 %v3933_v10, %v3932_v49 }
 0x3e5   : > { %v3935_v33 = vrot.slane %v3934_v45, 2 }
 0x3e7   : > { %v3936_v63 = vadd.f32 %v3935_v33, %v3934_v45 }
 0x3e9   : > { %v3937_v61 = vrot.slane %v3936_v63, 1 }
 0x3eb   : > { %v3938_v5 = vadd.f32 %v3937_v61, %v3936_v63 }
 0x3ed   : > { %8039 = vrcp.f32 %v3938_v5 }
 0x3f7   : > { %v8040_v13 = vpop.eup %8039 }
 0x3f8   : > { %v3940_v34 = vmul.f32 %v8040_v13, %v8038_v3 }
 0x3fa   : > { %4845 = vrot.lane.b32.xlu1 %v3940_v34, %s8119_s21  ;;  %4395 = vrot.lane.b32.xlu0 %v3940_v34, %s8120_s22  ;;  %v3943_v16 = vsel %vm3912_vm4, %v3940_v34, 0  ;;  %s9854_s21 = scalar_lea.hbm %s9904_s8, %s6002_s13  ;;  %s8045_s22 = scalar_lea.vmem %s9856_s18, 256 }
 0x3fb   : > { %v4015_v18 = vand.u32 4294901760, %v3943_v16  ;;  %p8046_p11 = scmp.ne.s32.totalorder %s9856_s18, %s8045_s22 }
 0x3fd   : > { %v4016_v35 = vsub.f32 %v3943_v16, %v4015_v18  ;;  %p8047_p12 = pnand %p8046_p11, %p8207_p5 }
 0x3fe   : > { %330 = vperm.xlu1 %8020, %v327_v38   ;;  %5295 = vrot.lane.b32.xlu0 %v3940_v34, %s8121_s25  ;;  %s8051_s25 = scalar_lea.vmem %s8050_s24, 512 }
 0x3ff   : > { %v4017_v9 = vand.u32 4294901760, %v4016_v35  ;;  %p8048_p13 = pneg %p8047_p12  ;;  %p8053_p1 = scmp.lt.s32.totalorder %s8051_s25, %s8045_s22 }
 0x401   : > { %v4018_v52 = vsub.f32 %v4016_v35, %v4017_v9  ;;  %p8054_p2 = por %p8053_p1, %p8052_p0 }
 0x402   : > { %8022 = vset.pattern.permute.xlu1 %v8115_v7 }
 0x403   : > { %v4019_v19 = vand.u32 4294901760, %v4018_v52  ;;  %p8055_p3 = pnand %p8054_p2, %p8048_p13 }
 0x405   : > { %7098 = vmatmul.mubr.f32.vlgmr.msra.gmra.mrb[22].mxu0 %v4019_v19 }
 0x406   : > { %7101 = vmatpush3.msra.mxu0 %v9726_v46  ;;  %7102 = vmatprep.mubr.msk.f32.mxu0 %vm8112_vm2, %v10231_v43 }
 0x407   : > { %7105 = vmatprep.subr.mxu0 %v10231_v43 }
 0x40d   : > { %7103 = vmatmul.mubr.f32.vlgmr.msra.gmra.mrb[22].mxu0 %v4015_v18 }
 0x40e   : > { %7106 = vmatpush3.msra.mxu0 %v9715_v23  ;;  %7107 = vmatprep.mubr.msk.f32.mxu0 %vm8112_vm2, %v10231_v43 }
 0x40f   : > { %7110 = vmatprep.subr.mxu0 %v10231_v43 }
 0x415   : > { %7108 = vmatmul.mubr.f32.vlgmr.msra.gmra.mrb[22].mxu0 %v4016_v35 }
 0x416   : > { %7111 = vmatpush3.msra.mxu0 %v9709_v50  ;;  %7112 = vmatprep.mubr.msk.f32.mxu0 %vm8112_vm2, %v10231_v43 }
 0x417   : > { %7115 = vmatprep.subr.mxu0 %v10231_v43 }
 0x41d   : > { %7113 = vmatmul.mubr.f32.vlgmr.msra.gmra.mrb[22].mxu0 %v4017_v9 }
 0x41e   : > { %7116 = vmatpush3.msra.mxu0 %v9719_v1  ;;  %7117 = vmatprep.mubr.msk.f32.mxu0 %vm8112_vm2, %v10231_v43 }
 0x41f   : > { %7120 = vmatprep.subr.mxu0 %v10231_v43 }
 0x425   : > { %7118 = vmatmul.mubr.f32.vlgmr.msra.gmra.mrb[22].mxu0 %v4015_v18 }
 0x426   : > { %7121 = vmatpush3.msra.mxu0 %v9709_v50  ;;  %7122 = vmatprep.mubr.msk.f32.mxu0 %vm8112_vm2, %v10231_v43 }
 0x427   : > { %7125 = vmatprep.subr.mxu0 %v10231_v43 }
 0x42d   : > { %7123 = vmatmul.mubr.f32.vlgmr.msra.gmra.mrb[22].mxu0 %v4015_v18 }
 0x42e   : > { %7126 = vmatpush3.msra.mxu0 %v9709_v50  ;;  %7127 = vmatprep.mubr.msk.f32.mxu0 %vm8112_vm2, %v10231_v43 }
 0x42f   : > { %7130 = vmatprep.subr.mxu0 %v10231_v43 }
 0x46c   : > { %v4396_v60 = vpop.permute.xlu0 %4395  ;;  %v4846_v17 = vpop.permute.xlu1 %4845 }
 0x46d   : > { %v4397_v32 = vsel %vm3912_vm4, %v4396_v60, 0  ;;  %v4847_v47 = vsel %vm3912_vm4, %v4846_v17, 0 }
 0x46e   : > { %v4465_v6 = vand.u32 4294901760, %v4397_v32  ;;  %v4915_v58 = vand.u32 4294901760, %v4847_v47 }
 0x470   : > { %v4466_v48 = vsub.f32 %v4397_v32, %v4465_v6  ;;  %v4916_v11 = vsub.f32 %v4847_v47, %v4915_v58  ;;  %v5296_v51 = vpop.permute.xlu0 %5295 }
 0x471   : > { %v5297_v41 = vsel %vm3912_vm4, %v5296_v51, 0 }
 0x472   : > { %v4467_v62 = vand.u32 4294901760, %v4466_v48  ;;  %v4917_v53 = vand.u32 4294901760, %v4916_v11  ;;  %v5365_v44 = vand.u32 4294901760, %v5297_v41 }
 0x474   : > { %v4468_v29 = vsub.f32 %v4466_v48, %v4467_v62  ;;  %v4918_v4 = vsub.f32 %v4916_v11, %v4917_v53  ;;  %v5366_v8 = vsub.f32 %v5297_v41, %v5365_v44 }
 0x476   : > { %v4469_v28 = vand.u32 4294901760, %v4468_v29  ;;  %v4919_v25 = vand.u32 4294901760, %v4918_v4  ;;  %v5367_v54 = vand.u32 4294901760, %v5366_v8 }
 0x478   : > { %7128 = vmatmul.mubr.f32.vlgmr.msra.gmra.mrb[24].mxu0 %v4469_v28  ;;  %v5368_v21 = vsub.f32 %v5366_v8, %v5367_v54 }
 0x479   : > { %7131 = vmatpush3.msra.mxu0 %v9726_v46  ;;  %7132 = vmatprep.mubr.msk.f32.mxu0 %vm8112_vm2, %v10231_v43 }
 0x47a   : > { %7135 = vmatprep.subr.mxu0 %v10231_v43  ;;  %v5369_v56 = vand.u32 4294901760, %v5368_v21 }
 0x480   : > { %7133 = vmatmul.mubr.f32.vlgmr.msra.gmra.mrb[24].mxu0 %v4465_v6 }
 0x481   : > { %7136 = vmatpush3.msra.mxu0 %v9715_v23  ;;  %7137 = vmatprep.mubr.msk.f32.mxu0 %vm8112_vm2, %v10231_v43 }
 0x482   : > { %7140 = vmatprep.subr.mxu0 %v10231_v43 }
 0x488   : > { %7138 = vmatmul.mubr.f32.vlgmr.msra.gmra.mrb[24].mxu0 %v4466_v48 }
 0x489   : > { %7141 = vmatpush3.msra.mxu0 %v9709_v50  ;;  %7142 = vmatprep.mubr.msk.f32.mxu0 %vm8112_vm2, %v10231_v43 }
 0x48a   : > { %7145 = vmatprep.subr.mxu0 %v10231_v43 }
 0x490   : > { %7143 = vmatmul.mubr.f32.vlgmr.msra.gmra.mrb[24].mxu0 %v4467_v62 }
 0x491   : > { %7146 = vmatpush3.msra.mxu0 %v9719_v1  ;;  %7147 = vmatprep.mubr.msk.f32.mxu0 %vm8112_vm2, %v10231_v43 }
 0x492   : > { %7150 = vmatprep.subr.mxu0 %v10231_v43 }
 0x498   : > { %7148 = vmatmul.mubr.f32.vlgmr.msra.gmra.mrb[24].mxu0 %v4465_v6 }
 0x499   : > { %7151 = vmatpush3.msra.mxu0 %v9709_v50  ;;  %7152 = vmatprep.mubr.msk.f32.mxu0 %vm8112_vm2, %v10231_v43 }
 0x49a   : > { %7155 = vmatprep.subr.mxu0 %v10231_v43 }
 0x4a0   : > { %7153 = vmatmul.mubr.f32.vlgmr.msra.gmra.mrb[24].mxu0 %v4465_v6 }
 0x4a1   : > { %7156 = vmatpush3.msra.mxu0 %v9709_v50  ;;  %7157 = vmatprep.mubr.msk.f32.mxu0 %vm8112_vm2, %v10231_v43 }
 0x4a2   : > { %7160 = vmatprep.subr.mxu0 %v10231_v43 }
 0x4a4   : > { %7158 = vmatmul.mubr.f32.vlgmr.msra.gmra.mrb[26].mxu0 %v4919_v25 }
 0x4a5   : > { %7161 = vmatpush3.msra.mxu0 %v9726_v46  ;;  %7162 = vmatprep.mubr.msk.f32.mxu0 %vm8112_vm2, %v10231_v43 }
 0x4a6   : > { %7165 = vmatprep.subr.mxu0 %v10231_v43 }
 0x4ac   : > { %7163 = vmatmul.mubr.f32.vlgmr.msra.gmra.mrb[26].mxu0 %v4915_v58 }
 0x4ad   : > { %7166 = vmatpush3.msra.mxu0 %v9715_v23  ;;  %7167 = vmatprep.mubr.msk.f32.mxu0 %vm8112_vm2, %v10231_v43 }
 0x4ae   : > { %7170 = vmatprep.subr.mxu0 %v10231_v43 }
 0x4b4   : > { %7168 = vmatmul.mubr.f32.vlgmr.msra.gmra.mrb[26].mxu0 %v4916_v11 }
 0x4b5   : > { %7171 = vmatpush3.msra.mxu0 %v9709_v50  ;;  %7172 = vmatprep.mubr.msk.f32.mxu0 %vm8112_vm2, %v10231_v43 }
 0x4b6   : > { %7175 = vmatprep.subr.mxu0 %v10231_v43 }
 0x4bc   : > { %7173 = vmatmul.mubr.f32.vlgmr.msra.gmra.mrb[26].mxu0 %v4917_v53 }
 0x4bd   : > { %7176 = vmatpush3.msra.mxu0 %v9719_v1  ;;  %7177 = vmatprep.mubr.msk.f32.mxu0 %vm8112_vm2, %v10231_v43 }
 0x4be   : > { %7180 = vmatprep.subr.mxu0 %v10231_v43 }
 0x4c4   : > { %7178 = vmatmul.mubr.f32.vlgmr.msra.gmra.mrb[26].mxu0 %v4915_v58 }
 0x4c5   : > { %7181 = vmatpush3.msra.mxu0 %v9709_v50  ;;  %7182 = vmatprep.mubr.msk.f32.mxu0 %vm8112_vm2, %v10231_v43 }
 0x4c6   : > { %7185 = vmatprep.subr.mxu0 %v10231_v43 }
 0x4cc   : > { %7183 = vmatmul.mubr.f32.vlgmr.msra.gmra.mrb[26].mxu0 %v4915_v58 }
 0x4cd   : > { %7186 = vmatpush3.msra.mxu0 %v9709_v50  ;;  %7187 = vmatprep.mubr.msk.f32.mxu0 %vm8112_vm2, %v10231_v43 }
 0x4ce   : > { %7190 = vmatprep.subr.mxu0 %v10231_v43 }
 0x4d0   : > { %7188 = vmatmul.mubr.f32.vlgmr.msra.gmra.mrb[28].mxu0 %v5369_v56 }
 0x4d1   : > { %7191 = vmatpush3.msra.mxu0 %v9726_v46  ;;  %7192 = vmatprep.mubr.msk.f32.mxu0 %vm8112_vm2, %v10231_v43 }
 0x4d2   : > { %7195 = vmatprep.subr.mxu0 %v10231_v43 }
 0x4d8   : > { %7193 = vmatmul.mubr.f32.vlgmr.msra.gmra.mrb[28].mxu0 %v5365_v44 }
 0x4d9   : > { %7196 = vmatpush3.msra.mxu0 %v9715_v23  ;;  %7197 = vmatprep.mubr.msk.f32.mxu0 %vm8112_vm2, %v10231_v43 }
 0x4da   : > { %7200 = vmatprep.subr.mxu0 %v10231_v43 }
 0x4e0   : > { %7198 = vmatmul.mubr.f32.vlgmr.msra.gmra.mrb[28].mxu0 %v5366_v8 }
 0x4e1   : > { %7201 = vmatpush3.msra.mxu0 %v9709_v50  ;;  %7202 = vmatprep.mubr.msk.f32.mxu0 %vm8112_vm2, %v10231_v43 }
 0x4e2   : > { %7205 = vmatprep.subr.mxu0 %v10231_v43 }
 0x4e8   : > { %7203 = vmatmul.mubr.f32.vlgmr.msra.gmra.mrb[28].mxu0 %v5367_v54 }
 0x4e9   : > { %7206 = vmatpush3.msra.mxu0 %v9719_v1  ;;  %7207 = vmatprep.mubr.msk.f32.mxu0 %vm8112_vm2, %v10231_v43 }
 0x4ea   : > { %7210 = vmatprep.subr.mxu0 %v10231_v43 }
 0x4f0   : > { %7208 = vmatmul.mubr.f32.vlgmr.msra.gmra.mrb[28].mxu0 %v5365_v44 }
 0x4f1   : > { %7211 = vmatpush3.msra.mxu0 %v9709_v50  ;;  %7212 = vmatprep.mubr.msk.f32.mxu0 %vm8112_vm2, %v10231_v43  ;;  %v331_v43 = vpop.permute.xlu1 %330 }
 0x4f2   : > { %v7887_v26 = vadd.f32 %v9496_v37, %v331_v43 }
 0x4f8   : > { %7213 = vmatmul.mubr.f32.vlgmr.msra.gmra.mrb[28].mxu0 %v5365_v44 }
 0x500   : > { %v4391_v55 = vpop.f32.mrb[22].mxu0 }
 0x501   : > { %v7124_v36 = vpop.f32.mrb[23].mxu0 }
 0x573   : > { %v4841_v59 = vpop.f32.mrb[24].mxu0 }
 0x574   : > { %5852 = vperm.xlu1 %8022, %v4841_v59   ;;  %5788 = vperm.xlu0 %8021, %v4841_v59   ;;  %v7154_v42 = vpop.f32.mrb[25].mxu0 }
 0x578   : > { %8023 = vset.pattern.permute.xlu1 %v10325_v31  ;;  %8024 = vset.pattern.permute.xlu0 %v8115_v7 }
 0x59f   : > { %v5291_v40 = vpop.f32.mrb[26].mxu0 }
 0x5a0   : > { %v7184_v14 = vpop.f32.mrb[27].mxu0 }
 0x5cb   : > { %v5741_v20 = vpop.f32.mrb[28].mxu0 }
 0x5cc   : > { %5868 = vperm.xlu0 %8024, %v5741_v20   ;;  %5804 = vperm.xlu1 %8023, %v5741_v20   ;;  %v7214_v50 = vpop.f32.mrb[29].mxu0 }
 0x5d0   : > { %8027 = vset.pattern.permute.xlu0 %v8114_v39  ;;  %8025 = vset.pattern.permute.xlu1 %v10326_v0 }
 0x5d1   : > { %5820 = vperm.xlu0 %8027, %v4841_v59   ;;  %5754 = vperm.xlu1 %8025, %v4841_v59  }
 0x5d5   : > { %8030 = vset.pattern.permute.xlu0 %v8115_v7  ;;  %8026 = vset.pattern.permute.xlu1 %v10325_v31 }
 0x5d6   : > { %5862 = vperm.xlu0 %8030, %v5291_v40   ;;  %5782 = vperm.xlu1 %8026, %v4391_v55  }
 0x5da   : > { %8028 = vset.pattern.permute.xlu1 %v8115_v7  ;;  %8033 = vset.pattern.permute.xlu0 %v10326_v0 }
 0x5db   : > { %5846 = vperm.xlu1 %8028, %v4391_v55  }
 0x5df   : > { %8029 = vset.pattern.permute.xlu1 %v10325_v31  ;;  %v7888_v31 = vadd.f32 %v9499_v15, %v331_v43 }
 0x5e0   : > { %5798 = vperm.xlu1 %8029, %v5291_v40  }
 0x5e4   : > { %8031 = vset.pattern.permute.xlu1 %v10326_v0 }
 0x5e5   : > { %5772 = vperm.xlu1 %8031, %v5741_v20  }
 0x5e9   : > { %8032 = vset.pattern.permute.xlu1 %v8114_v39 }
 0x5ea   : > { %5836 = vperm.xlu1 %8032, %v5741_v20  }
 0x5f3   : > { %v5853_v30 = vpop.permute.xlu1 %5852  ;;  %v5789_v24 = vpop.permute.xlu0 %5788 }
 0x5f4   : > { %v5855_v22 = vmul.f32 %v7887_v26, %v5853_v30  ;;  %v5791_v27 = vmul.f32 %v7887_v26, %v5789_v24 }
 0x5f6   : > { %5793 = vrot.lane.b32.xlu0 %v5791_v27, %s8122_s26  ;;  %5857 = vrot.lane.b32.xlu1 %v5855_v22, %s8122_s26 }
 0x64b   : > { %v5869_v2 = vpop.permute.xlu0 %5868  ;;  %v5805_v57 = vpop.permute.xlu1 %5804 }
 0x64c   : > { %v5871_v3 = vmul.f32 %v7888_v31, %v5869_v2  ;;  %v5807_v49 = vmul.f32 %v7888_v31, %v5805_v57 }
 0x64e   : > { %5873 = vrot.lane.b32.xlu1 %v5871_v3, %s8122_s26  ;;  %5809 = vrot.lane.b32.xlu0 %v5807_v49, %s8122_s26 }
 0x650   : > { %v5755_v37 = vpop.permute.xlu1 %5754  ;;  %v5821_v15 = vpop.permute.xlu0 %5820 }
 0x651   : > { %v5757_v45 = vmul.f32 %v7887_v26, %v5755_v37  ;;  %v5823_v63 = vmul.f32 %v7887_v26, %v5821_v15 }
 0x652   : > { %5814 = vperm.xlu1 %8032, %v4391_v55   ;;  %5747 = vperm.xlu0 %8033, %v4391_v55  }
 0x655   : > { %v5783_v10 = vpop.permute.xlu1 %5782  ;;  %v5863_v5 = vpop.permute.xlu0 %5862 }
 0x656   : > { %8034 = vset.pattern.permute.xlu1 %v10326_v0  ;;  %8035 = vset.pattern.permute.xlu0 %v8114_v39  ;;  %v5785_v34 = vmul.f32 %v7887_v26, %v5783_v10  ;;  %v5865_v9 = vmul.f32 %v7888_v31, %v5863_v5 }
 0x657   : > { %5765 = vperm.xlu1 %8034, %v5291_v40   ;;  %5830 = vperm.xlu0 %8035, %v5291_v40  }
 0x65a   : > { %v5847_v33 = vpop.permute.xlu1 %5846 }
 0x65b   : > { %5759 = vrot.lane.b32.xlu1 %v5757_v45, %s8122_s26  ;;  %8036 = vset.pattern.permute.xlu0 %v8115_v7  ;;  %v5849_v7 = vmul.f32 %v7887_v26, %v5847_v33 }
 0x65f   : > { %5825 = vrot.lane.b32.xlu1 %v5823_v63, %s8122_s26  ;;  %v5799_v61 = vpop.permute.xlu1 %5798 }
 0x660   : > { %v5801_v0 = vmul.f32 %v7888_v31, %v5799_v61 }
 0x664   : > { %v5773_v23 = vpop.permute.xlu1 %5772 }
 0x665   : > { %v5775_v13 = vmul.f32 %v7888_v31, %v5773_v23 }
 0x667   : > { %5777 = vrot.lane.b32.xlu0 %v5775_v13, %s8122_s26 }
 0x668   : > { %v5794_v39 = vpop.permute.xlu0 %5793 }
 0x669   : > { %v5796_v16 = vadd.f32 %v5794_v39, %v5785_v34  ;;  %v5837_v1 = vpop.permute.xlu1 %5836 }
 0x66a   : > { %v5839_v38 = vmul.f32 %v7888_v31, %v5837_v1 }
 0x66b   : > { %v5802_v18 = vadd.f32 %v5801_v0, %v5796_v16 }
 0x66c   : > { %5841 = vrot.lane.b32.xlu1 %v5839_v38, %s8122_s26 }
 0x66d   : > { %v5858_v35 = vpop.permute.xlu1 %5857 }
 0x66e   : > { %v5860_v12 = vadd.f32 %v5858_v35, %v5849_v7 }
 0x670   : > { %v5866_v52 = vadd.f32 %v5865_v9, %v5860_v12 }
 0x6c0   : > { %v5810_v46 = vpop.permute.xlu0 %5809  ;;  %v5874_v19 = vpop.permute.xlu1 %5873 }
 0x6c1   : > { %v5812_v60 = vadd.f32 %v5810_v46, %v5802_v18  ;;  %v5876_v32 = vadd.f32 %v5874_v19, %v5866_v52 }
 0x6c3   : > { %5878 = vrot.lane.b32.xlu0 %v5812_v60, %s8122_s26  ;;  %5882 = vrot.lane.b32.xlu1 %v5876_v32, %s8122_s26 }
 0x6d1   : > { %v5815_v6 = vpop.permute.xlu1 %5814  ;;  %v5748_v29 = vpop.permute.xlu0 %5747 }
 0x6d2   : > { %v5750_v17 = vmul.f32 %v7887_v26, %v5748_v29  ;;  %v5817_v47 = vmul.f32 %v7887_v26, %v5815_v6 }
 0x6d6   : > { %v5766_v48 = vpop.permute.xlu1 %5765  ;;  %v5831_v58 = vpop.permute.xlu0 %5830 }
 0x6d7   : > { %v5833_v4 = vmul.f32 %v7888_v31, %v5831_v58  ;;  %v5768_v25 = vmul.f32 %v7888_v31, %v5766_v48 }
 0x6da   : > { %v5760_v62 = vpop.permute.xlu1 %5759  ;;  %v5778_v44 = vpop.permute.xlu0 %5777 }
 0x6db   : > { %v5762_v11 = vadd.f32 %v5760_v62, %v5750_v17 }
 0x6dd   : > { %v5769_v51 = vadd.f32 %v5768_v25, %v5762_v11 }
 0x6de   : > { %v5826_v28 = vpop.permute.xlu1 %5825 }
 0x6df   : > { %v5828_v53 = vadd.f32 %v5826_v28, %v5817_v47  ;;  %v5780_v54 = vadd.f32 %v5778_v44, %v5769_v51 }
 0x6e1   : > { %v5834_v41 = vadd.f32 %v5833_v4, %v5828_v53 }
 0x6e2   : > { %v5842_v8 = vpop.permute.xlu1 %5841 }
 0x6e3   : > { %v5844_v21 = vadd.f32 %v5842_v8, %v5834_v41 }
 0x735   : > { %v5879_v56 = vpop.permute.xlu0 %5878  ;;  %v5883_v55 = vpop.permute.xlu1 %5882 }
 0x736   : > { %v5886_v36 = vsel %vm5885_vm9, %v5780_v54, %v5879_v56  ;;  %v5887_v59 = vsel %vm5885_vm9, %v5844_v21, %v5883_v55 }
 0x737   : > { %v5890_v42 = vmul.f32 1.442695, %v5886_v36  ;;  %v5892_v40 = vmul.f32 1.442695, %v5887_v59  ;;  %vm5888_vm10 = vcmp.gt.f32.partialorder %v5886_v36, 0.0  ;;  %vm5889_vm11 = vcmp.gt.f32.partialorder %v5887_v59, 0.0 }
 0x739   : > { %8041 = vpow2.f32 %v5890_v42 }
 0x73a   : > { %8043 = vpow2.f32 %v5892_v40 }
 0x743   : > { %v8042_v14 = vpop.eup %8041 }
 0x744   : > { %v8044_v20 = vpop.eup %8043  ;;  %v5994_v50 = vadd.f32 -1.0, %v8042_v14 }
 0x745   : > { %v5995_v43 = vadd.f32 -1.0, %v8044_v20 }
 0x746   : > { %v5896_v26 = vsel %vm5888_vm10, %v5886_v36, %v5994_v50 }
 0x747   : > { %5898 = vst [vmem:[%s313_s17] sm:$0xff] %v5896_v26  ;;  %v5897_v30 = vsel %vm5889_vm11, %v5887_v59, %v5995_v43 }
 0x748   : > { %5899 = vst [vmem:[%s313_s17 + $0x8] sm:$0xff] %v5897_v30 }
 0x749   : > { %8058 = shalt.err (!%p8055_p3)
}
 0x74a   : > { %s8059_s26 = scalar_lea.hbm %s9854_s21, 256  ;;  %s8063_s13 = scalar_lea.hbm %s9904_s8, 512 }
 0x74b   : > { %p8060_p4 = scmp.ne.s32.totalorder %s9854_s21, %s8059_s26  ;;  %p8064_p9 = scmp.lt.u32.totalorder %s9854_s21, %s9904_s8 }
 0x74c   : > { %p8065_p10 = scmp.lt.u32.totalorder %s8063_s13, %s8059_s26  ;;  %p8067_p12 = scmp.lt.u32.totalorder %s8059_s26, %s9854_s21 }
 0x74d   : > { %p8061_p7 = pnand %p8060_p4, %p8207_p5 }
 0x74e   : > { %p8066_p11 = por %p8065_p10, %p8064_p9 }
 0x74f   : > { %p8062_p8 = pneg %p8061_p7 }
 0x750   : > { %p8068_p13 = por %p8067_p12, %p8066_p11 }
 0x752   : > { %p8069_p0 = pnand %p8068_p13, %p8062_p8 }
 0x754   : > { %8072 = shalt.err (!%p8069_p0)
}
 0x755   : > { %7962 = dma.vmem_to_hbm [thread:$0]  (%p8207_p5), %s9856_s18, 256, %s9854_s21, %s5901_s9  }
 0x756 PF: > { %p7968_p1 = scmp.ge.s32.totalorder %s8107_s30, 2  ;;  %s5927_s20 = sand.u32 1, %s8095_s27  }
 0x757   : > { %s5928_s22 = scalar_lea.sflag [#allocation3], %s5927_s20 }
 0x758   : > { %p7965_p2 = pnand %p7968_p1, %p8211_p6 }
 0x75a   : > { %8090 = dma.done.wait (!%p7965_p2), %s5928_s22, 256  }
 0x75b   : > { %8092 = vsyncadd (!%p7965_p2), %s5928_s22, 4294967040  ;;  %p18_p3 = scmp.ge.s32.totalorder %s8194_s11, 4   ;;  %s10327_s27 = smov %s8099_s28 }
 0x75c   : > { %s10328_s28 = smov %s8103_s29  ;;  %s10329_s29 = smov %s8205_s14 }
 0x75d   : > { %s10330_s30 = smov %s8194_s11  ;;  %20 = sbr.rel (!%p18_p3) target bundleno = 3 (0x3), region = 90 }
 0x764   :  { %5933 = vsyncpa [#allocation3], 1 }
 0x765   :  { %5935 = vsyncpa [#allocation3 + $0x1], 1 }

</bundles_post_ra>
